<compile_context>
chip_gen: v5e
topology: v5e:2x2
jax: 0.10.0
libtpu: 0.0.40
codegen_flags: <defaults>
</compile_context>

<pallas_src>
import functools
import math

import jax
import jax.numpy as jnp
from jax.experimental import pallas as pl
from jax.experimental.pallas import tpu as pltpu


def _vmem_limit_bytes():
    """Per-generation VMEM limit: ~3/4 of physical, capped at 100 MiB."""
    try:
        info = pltpu.get_tpu_info()
        cap = getattr(info, "vmem_capacity_bytes", 128 * 1024 * 1024)
    except Exception:  # pragma: no cover - CPU / interpret fallback
        cap = 128 * 1024 * 1024
    return max(32 * 1024 * 1024, min(int(cap * 3 // 4), 100 * 1024 * 1024))


VMEM_LIMIT = _vmem_limit_bytes()
ROUTER_LANES = 128  # lane-dense width for router logits / routing-scale matrices

# ----------------------------- config ---------------------------------------
CFG = dict(
    vocab_size=128,
    hidden_size=128,
    num_attention_heads=4,
    num_key_value_heads=2,
    head_dim=128,                          # decoupled from hidden_size (as in Qwen2-MoE)
    intermediate_size=256,                 # dense MLP layer
    moe_intermediate_size=128,             # per-expert
    shared_expert_intermediate_size=128,
    num_experts=4,
    top_k=2,
    norm_topk_prob=True,
    num_hidden_layers=2,
    rms_norm_eps=1e-6,
    rope_theta=10000.0,
    pad_token_id=0,
    decoder_sparse_step=1,
    mlp_only_layers=(0,),                  # layer 0: dense MLP, layer 1: sparse MoE block
    token_block=128,                       # tm: 128-row MXU tiles, >=2 parallel grid blocks
)


def _cparams(*sem):
    return pltpu.CompilerParams(dimension_semantics=sem,
                                vmem_limit_bytes=VMEM_LIMIT)


# ----------------------------- Pallas kernels -------------------------------
def _norm_qkv_kernel(x_ref, r_ref, nw_ref, wq_ref, bq_ref, qkv_ref, nres_ref, *, eps):
    """(add+)RMSNorm fused into the QKV projection prologue (bf16 MXU, f32 accumulate)."""
    x = x_ref[...] + r_ref[...]                                   # f32
    nres_ref[...] = x
    var = jnp.mean(x * x, axis=-1, keepdims=True)
    xn = x * jax.lax.rsqrt(var + eps) * nw_ref[...]
    acc = jnp.dot(xn.astype(jnp.bfloat16), wq_ref[...],
                  preferred_element_type=jnp.float32)
    qkv_ref[...] = (acc + bq_ref[...]).astype(qkv_ref.dtype)      # bf16 qkv intermediate


def _attn_oproj_kernel(q_ref, k_ref, v_ref, cos_ref, sin_ref, wo_ref, o_ref, acc_ref,
                       *, rep, head_dim, scale):
    """RoPE + causal attention for one (batch, kv-group) grid step, o_proj accumulated.

    The `rep` query heads sharing this KV head are stacked into one [rep*S, D] MXU pass;
    K is RoPE'd exactly once per KV head; the per-group o_proj contribution is accumulated
    into an f32 VMEM scratch across the "arbitrary" kv-group grid axis."""
    g = pl.program_id(1)
    n_groups = pl.num_programs(1)
    seq = k_ref.shape[0]
    half = head_dim // 2

    cos = cos_ref[...]                                            # f32 [S, D]
    sin = sin_ref[...]
    lane = jax.lax.broadcasted_iota(jnp.int32, (1, head_dim), 1)
    rot_sign = jnp.where(lane < half, -1.0, 1.0).astype(jnp.float32)

    def rope(x):
        # rotate_half via XLU lane roll + sign mask (no cross-lane slice/concat)
        return x * cos + pltpu.roll(x, shift=half, axis=1) * sin * rot_sign

    k = rope(k_ref[...].astype(jnp.float32)).astype(jnp.bfloat16)   # once per KV head
    v = v_ref[...]                                                  # bf16

    q_parts = [rope(q_ref[:, r * head_dim:(r + 1) * head_dim].astype(jnp.float32))
               for r in range(rep)]
    q = jnp.concatenate(q_parts, axis=0).astype(jnp.bfloat16)       # [rep*S, D]

    s = jnp.dot(q, k.T, preferred_element_type=jnp.float32) * scale  # [rep*S, S]
    row = jax.lax.broadcasted_iota(jnp.int32, (seq, seq), 0)
    col = jax.lax.broadcasted_iota(jnp.int32, (seq, seq), 1)
    causal = jnp.concatenate([col <= row] * rep, axis=0)
    s = jnp.where(causal, s, -1e30)
    m = jnp.max(s, axis=-1, keepdims=True)
    p = jnp.exp(s - m)
    l = jnp.sum(p, axis=-1, keepdims=True)
    ctx = jnp.dot(p.astype(jnp.bfloat16), v, preferred_element_type=jnp.float32)
    ctx = ctx * pl.reciprocal(l, approx=True)                       # EUP, off the VALU path
    # regroup [rep*S, D] -> [S, rep*D] (128-aligned static slices) and project
    ctx_g = jnp.concatenate([ctx[r * seq:(r + 1) * seq] for r in range(rep)], axis=-1)
    contrib = jnp.dot(ctx_g.astype(jnp.bfloat16), wo_ref[...],
                      preferred_element_type=jnp.float32)           # [S, H]

    @pl.when(g == 0)
    def _():
        acc_ref[...] = jnp.zeros_like(acc_ref)

    acc_ref[...] += contrib

    @pl.when(g == n_groups - 1)
    def _():
        o_ref[...] = acc_ref[...].astype(o_ref.dtype)


def _norm_mlp_kernel(x_ref, r_ref, nw_ref, wgu_ref, wd_ref, o_ref, nres_ref, *, eps, inter):
    """add+RMSNorm fused into the dense MLP prologue; gate/up merged into one bf16 matmul."""
    x = x_ref[...] + r_ref[...]
    nres_ref[...] = x
    var = jnp.mean(x * x, axis=-1, keepdims=True)
    xn = (x * jax.lax.rsqrt(var + eps) * nw_ref[...]).astype(jnp.bfloat16)
    gu = jnp.dot(xn, wgu_ref[...], preferred_element_type=jnp.float32)   # [tm, 2I]
    g = gu[:, :inter]
    u = gu[:, inter:]
    act = (g * jax.nn.sigmoid(g) * u).astype(jnp.bfloat16)               # SiluAndMul (f32 math)
    o_ref[...] = jnp.dot(act, wd_ref[...],
                         preferred_element_type=jnp.float32).astype(o_ref.dtype)


def _norm_moe_pre_kernel(x_ref, r_ref, nw_ref, wgu_ref, wds_ref, wrg_ref,
                         hn_ref, nres_ref, logits_ref, shared_ref, *, eps, inter, n_experts):
    """MoE path prologue: add+RMSNorm, lane-dense router logits + shared-expert sigmoid
    gate (one padded [H,128] matmul), and the gated shared-expert MLP — all fused."""
    x = x_ref[...] + r_ref[...]
    nres_ref[...] = x
    var = jnp.mean(x * x, axis=-1, keepdims=True)
    xn = x * jax.lax.rsqrt(var + eps) * nw_ref[...]
    xb = xn.astype(jnp.bfloat16)
    hn_ref[...] = xb

    rg = jnp.dot(xb, wrg_ref[...], preferred_element_type=jnp.float32)   # [tm, 128]
    logits_ref[...] = rg                                                 # lane-dense store
    sgate = jax.nn.sigmoid(rg[:, n_experts:n_experts + 1])               # [tm, 1]

    gu = jnp.dot(xb, wgu_ref[...], preferred_element_type=jnp.float32)   # [tm, 2*I_sh]
    g = gu[:, :inter]
    u = gu[:, inter:]
    act = (g * jax.nn.sigmoid(g) * u).astype(jnp.bfloat16)
    down = jnp.dot(act, wds_ref[...], preferred_element_type=jnp.float32)
    shared_ref[...] = sgate * down


def _moe_experts_kernel(elist_ref, cnt_ref, hn_ref, scale_ref, shared_ref,
                        wgu_ref, wd_ref, o_ref, acc_ref, *, inter, n_experts):
    """Expert loop: grid = (token blocks ["parallel"], expert slots ["arbitrary"]).

    The scalar-prefetched compacted expert list drives the expert-weight index_map
    (padded slots repeat the previous index -> no new weight DMA for skipped experts).
    f32 VMEM accumulator is seeded with the shared-expert output at slot 0 and stored
    exactly once on the last slot."""
    i = pl.program_id(0)
    e = pl.program_id(1)

    @pl.when(e == 0)
    def _():
        acc_ref[...] = shared_ref[...].astype(jnp.float32)

    @pl.when(e < cnt_ref[i])
    def _():
        expert = elist_ref[i * n_experts + e]                      # actual expert id (SMEM)
        lane = jax.lax.broadcasted_iota(jnp.int32, scale_ref.shape, 1)
        scale = jnp.sum(jnp.where(lane == expert, scale_ref[...], 0.0),
                        axis=-1, keepdims=True)                    # [tm, 1] routing weight
        x = hn_ref[...]                                            # bf16
        gu = jnp.dot(x, wgu_ref[0], preferred_element_type=jnp.float32)   # [tm, 2I]
        g = gu[:, :inter]
        u = gu[:, inter:]
        act = (g * jax.nn.sigmoid(g) * u * scale).astype(jnp.bfloat16)    # scale commutes
        acc_ref[...] += jnp.dot(act, wd_ref[0], preferred_element_type=jnp.float32)

    @pl.when(e == n_experts - 1)
    def _():
        o_ref[...] = acc_ref[...].astype(o_ref.dtype)


def _add_norm_kernel(x_ref, r_ref, nw_ref, o_ref, *, eps):
    x = x_ref[...] + r_ref[...]
    var = jnp.mean(x * x, axis=-1, keepdims=True)
    o_ref[...] = (x * jax.lax.rsqrt(var + eps) * nw_ref[...]).astype(o_ref.dtype)


# ----------------------------- wrappers --------------------------------------
def norm_qkv(x, res, norm_w, w_qkv, b_qkv, eps, tm):
    T, H = x.shape
    W = w_qkv.shape[1]
    nb = T // tm
    return pl.pallas_call(
        functools.partial(_norm_qkv_kernel, eps=eps),
        out_shape=(jax.ShapeDtypeStruct((T, W), jnp.bfloat16),     # qkv intermediate (bf16)
                   jax.ShapeDtypeStruct((T, H), jnp.float32)),     # new residual
        grid=(nb,),
        in_specs=[pl.BlockSpec((tm, H), lambda i: (i, 0)),
                  pl.BlockSpec((tm, H), lambda i: (i, 0)),
                  pl.BlockSpec((1, H), lambda i: (0, 0)),
                  pl.BlockSpec((H, W), lambda i: (0, 0)),
                  pl.BlockSpec((1, W), lambda i: (0, 0))],
        out_specs=(pl.BlockSpec((tm, W), lambda i: (i, 0)),
                   pl.BlockSpec((tm, H), lambda i: (i, 0))),
        compiler_params=_cparams("parallel"),
    )(x, res, norm_w, w_qkv, b_qkv)


def attention_oproj(qkv, cos, sin, w_o, batch, seq, nq, nkv, head_dim):
    rep = nq // nkv
    H = w_o.shape[1]
    scale = 1.0 / math.sqrt(head_dim)
    kern = functools.partial(_attn_oproj_kernel, rep=rep, head_dim=head_dim, scale=scale)
    # The same fused qkv array is passed three times; BlockSpecs slice out the q-group,
    # k and v column blocks (all 128-aligned) so the kernel never does dynamic lane slicing.
    return pl.pallas_call(
        kern,
        out_shape=jax.ShapeDtypeStruct((batch * seq, H), jnp.float32),
        grid=(batch, nkv),
        in_specs=[pl.BlockSpec((seq, rep * head_dim), lambda b, g: (b, g)),
                  pl.BlockSpec((seq, head_dim), lambda b, g: (b, nq + g)),
                  pl.BlockSpec((seq, head_dim), lambda b, g: (b, nq + nkv + g)),
                  pl.BlockSpec((seq, head_dim), lambda b, g: (0, 0)),
                  pl.BlockSpec((seq, head_dim), lambda b, g: (0, 0)),
                  pl.BlockSpec((rep * head_dim, H), lambda b, g: (g, 0))],
        out_specs=pl.BlockSpec((seq, H), lambda b, g: (b, 0)),
        scratch_shapes=[pltpu.VMEM((seq, H), jnp.float32)],
        compiler_params=_cparams("parallel", "arbitrary"),
    )(qkv, qkv, qkv, cos, sin, w_o)


def norm_mlp(x, res, norm_w, w_gate_up, w_down, eps, tm):
    T, H = x.shape
    I2 = w_gate_up.shape[1]
    nb = T // tm
    return pl.pallas_call(
        functools.partial(_norm_mlp_kernel, eps=eps, inter=I2 // 2),
        out_shape=(jax.ShapeDtypeStruct((T, H), jnp.float32),
                   jax.ShapeDtypeStruct((T, H), jnp.float32)),
        grid=(nb,),
        in_specs=[pl.BlockSpec((tm, H), lambda i: (i, 0)),
                  pl.BlockSpec((tm, H), lambda i: (i, 0)),
                  pl.BlockSpec((1, H), lambda i: (0, 0)),
                  pl.BlockSpec((H, I2), lambda i: (0, 0)),
                  pl.BlockSpec((I2 // 2, H), lambda i: (0, 0))],
        out_specs=(pl.BlockSpec((tm, H), lambda i: (i, 0)),
                   pl.BlockSpec((tm, H), lambda i: (i, 0))),
        compiler_params=_cparams("parallel"),
    )(x, res, norm_w, w_gate_up, w_down)


def norm_moe_pre(x, res, norm_w, w_gate_up_s, w_down_s, w_rg, eps, n_experts, tm):
    T, H = x.shape
    I2 = w_gate_up_s.shape[1]
    RG = w_rg.shape[1]                                             # 128 (lane-padded)
    nb = T // tm
    return pl.pallas_call(
        functools.partial(_norm_moe_pre_kernel, eps=eps, inter=I2 // 2, n_experts=n_experts),
        out_shape=(jax.ShapeDtypeStruct((T, H), jnp.bfloat16),     # normed hidden (bf16)
                   jax.ShapeDtypeStruct((T, H), jnp.float32),      # new residual
                   jax.ShapeDtypeStruct((T, RG), jnp.float32),     # lane-dense router logits
                   jax.ShapeDtypeStruct((T, H), jnp.float32)),     # gated shared-expert out
        grid=(nb,),
        in_specs=[pl.BlockSpec((tm, H), lambda i: (i, 0)),
                  pl.BlockSpec((tm, H), lambda i: (i, 0)),
                  pl.BlockSpec((1, H), lambda i: (0, 0)),
                  pl.BlockSpec((H, I2), lambda i: (0, 0)),
                  pl.BlockSpec((I2 // 2, H), lambda i: (0, 0)),
                  pl.BlockSpec((H, RG), lambda i: (0, 0))],
        out_specs=(pl.BlockSpec((tm, H), lambda i: (i, 0)),
                   pl.BlockSpec((tm, H), lambda i: (i, 0)),
                   pl.BlockSpec((tm, RG), lambda i: (i, 0)),
                   pl.BlockSpec((tm, H), lambda i: (i, 0))),
        compiler_params=_cparams("parallel"),
    )(x, res, norm_w, w_gate_up_s, w_down_s, w_rg)


def moe_experts(hn, elist, cnt, scale_pad, shared, w_gate_up_e, w_down_e, tm):
    T, H = hn.shape
    E, _, I2 = w_gate_up_e.shape
    LANES = scale_pad.shape[1]
    nb = T // tm
    kern = functools.partial(_moe_experts_kernel, inter=I2 // 2, n_experts=E)
    grid_spec = pltpu.PrefetchScalarGridSpec(
        num_scalar_prefetch=2,                                     # elist (flat), cnt
        grid=(nb, E),
        in_specs=[
            pl.BlockSpec((tm, H), lambda i, e, el, cn: (i, 0)),
            pl.BlockSpec((tm, LANES), lambda i, e, el, cn: (i, 0)),
            pl.BlockSpec((tm, H), lambda i, e, el, cn: (i, 0)),
            # expert weights indexed by the scalar-prefetched compacted hit list; padded
            # slots repeat the previous index -> the DMA is skipped, not just the compute.
            pl.BlockSpec((1, H, I2), lambda i, e, el, cn: (el[i * E + e], 0, 0)),
            pl.BlockSpec((1, I2 // 2, H), lambda i, e, el, cn: (el[i * E + e], 0, 0)),
        ],
        out_specs=pl.BlockSpec((tm, H), lambda i, e, el, cn: (i, 0)),
        scratch_shapes=[pltpu.VMEM((tm, H), jnp.float32)],
    )
    return pl.pallas_call(
        kern,
        out_shape=jax.ShapeDtypeStruct((T, H), jnp.float32),
        grid_spec=grid_spec,
        compiler_params=_cparams("parallel", "arbitrary"),
    )(elist, cnt, hn, scale_pad, shared, w_gate_up_e, w_down_e)


def add_rmsnorm_final(x, res, norm_w, eps, tm):
    T, H = x.shape
    nb = T // tm
    return pl.pallas_call(
        functools.partial(_add_norm_kernel, eps=eps),
        out_shape=jax.ShapeDtypeStruct((T, H), jnp.float32),
        grid=(nb,),
        in_specs=[pl.BlockSpec((tm, H), lambda i: (i, 0)),
                  pl.BlockSpec((tm, H), lambda i: (i, 0)),
                  pl.BlockSpec((1, H), lambda i: (0, 0))],
        out_specs=pl.BlockSpec((tm, H), lambda i: (i, 0)),
        compiler_params=_cparams("parallel"),
    )(x, res, norm_w)


# ----------------------------- glue ------------------------------------------
def rotary_cos_sin(positions, dim, base):
    inv_freq = 1.0 / (base ** (jnp.arange(0, dim, 2, dtype=jnp.float32) / dim))
    freqs = positions.astype(jnp.float32)[:, None] * inv_freq[None, :]
    emb = jnp.concatenate([freqs, freqs], axis=-1)
    return jnp.cos(emb), jnp.sin(emb)                              # each [S, dim]


def init_params(key, cfg):
    H = cfg['hidden_size']
    D = cfg['head_dim']
    nq = cfg['num_attention_heads']
    nkv = cfg['num_key_value_heads']
    E = cfg['num_experts']
    I_moe = cfg['moe_intermediate_size']
    I_sh = cfg['shared_expert_intermediate_size']
    I_dense = cfg['intermediate_size']
    W = (nq + 2 * nkv) * D

    keys = iter(jax.random.split(key, 256))

    def nrm(shape, scale=0.05, dtype=jnp.bfloat16):
        return (scale * jax.random.normal(next(keys), shape, jnp.float32)).astype(dtype)

    emb = nrm((cfg['vocab_size'], H), dtype=jnp.float32)
    emb = emb.at[cfg['pad_token_id']].set(0.0)                     # nn.Embedding padding_idx

    layers = []
    for li in range(cfg['num_hidden_layers']):
        is_moe = (li not in cfg['mlp_only_layers'] and cfg['num_experts'] > 0
                  and (li + 1) % cfg['decoder_sparse_step'] == 0)
        lp = dict(
            is_moe=is_moe,
            input_norm=1.0 + nrm((1, H), 0.02, jnp.float32),
            post_norm=1.0 + nrm((1, H), 0.02, jnp.float32),
            w_qkv=nrm((H, W)),                                     # bf16 MXU weights
            b_qkv=nrm((1, W), dtype=jnp.float32),
            w_o=nrm((nq * D, H)),
        )
        if is_moe:
            # router [H,E] and shared-expert sigmoid gate [H,1] merged + zero-padded to a
            # single lane-dense [H, 128] matmul (cols 0..E-1 router, col E gate, rest 0)
            w_rg = jnp.zeros((H, ROUTER_LANES), jnp.float32)
            w_rg = w_rg.at[:, :E].set(nrm((H, E), dtype=jnp.float32))
            w_rg = w_rg.at[:, E:E + 1].set(nrm((H, 1), dtype=jnp.float32))
            lp.update(
                w_rg=w_rg.astype(jnp.bfloat16),
                w_gate_up_e=nrm((E, H, 2 * I_moe)),                # merged gate||up per expert
                w_down_e=nrm((E, I_moe, H)),
                w_gate_up_s=nrm((H, 2 * I_sh)),
                w_down_s=nrm((I_sh, H)),
            )
        else:
            lp.update(
                w_gate_up=nrm((H, 2 * I_dense)),
                w_down=nrm((I_dense, H)),
            )
        layers.append(lp)

    return dict(embed=emb, layers=layers, final_norm=1.0 + nrm((1, H), 0.02, jnp.float32))


def qwen2_moe_forward(params, input_ids, position_ids, cfg):
    H = cfg['hidden_size']
    D = cfg['head_dim']
    nq = cfg['num_attention_heads']
    nkv = cfg['num_key_value_heads']
    E = cfg['num_experts']
    eps = cfg['rms_norm_eps']
    tm = cfg['token_block']
    top_k = cfg['top_k']
    B, S = input_ids.shape
    T = B * S
    assert T % tm == 0
    nb = T // tm

    h = params['embed'][input_ids].reshape(T, H).astype(jnp.float32)   # embedding gather
    cos, sin = rotary_cos_sin(position_ids[0], D, cfg['rope_theta'])   # [S, D]

    # layer-0 "residual is None" path: residual := h is realized by adding zeros in-kernel
    residual = jnp.zeros_like(h)
    for lp in params['layers']:
        # fused (add+)RMSNorm -> QKV projection (+bias), bf16 qkv intermediate
        qkv, residual = norm_qkv(h, residual, lp['input_norm'],
                                 lp['w_qkv'], lp['b_qkv'], eps, tm)
        # fused RoPE + causal attention per (batch, kv-group) + accumulated o_proj
        attn_o = attention_oproj(qkv, cos, sin, lp['w_o'], B, S, nq, nkv, D)

        if lp['is_moe']:
            hn, residual, logits_pad, shared = norm_moe_pre(
                attn_o, residual, lp['post_norm'],
                lp['w_gate_up_s'], lp['w_down_s'], lp['w_rg'], eps, E, tm)
            # SoftmaxTopK routing (tiny, stays in XLA glue)
            logits = logits_pad[:, :E]
            probs = jax.nn.softmax(logits, axis=-1)
            topv, topi = jax.lax.top_k(probs, top_k)
            if cfg['norm_topk_prob']:
                topv = topv / jnp.sum(topv, axis=-1, keepdims=True)
            topi = topi.astype(jnp.int32)
            # dense lane-padded [T, 128] per-token routing-scale matrix (column e in-kernel)
            onehot = topi[..., None] == jnp.arange(E, dtype=jnp.int32)[None, None, :]
            scale_dense = jnp.sum(jnp.where(onehot, topv[..., None], 0.0), axis=1)  # [T, E]
            scale_pad = jnp.zeros((T, ROUTER_LANES), jnp.float32).at[:, :E].set(scale_dense)
            # per-token-block compacted hit-expert list + count (scalar prefetch, 1-D SMEM)
            hit = jnp.any(topi.reshape(nb, tm * top_k, 1)
                          == jnp.arange(E, dtype=jnp.int32)[None, None, :], axis=1)   # [nb,E]
            cnt = jnp.sum(hit, axis=-1).astype(jnp.int32)                             # [nb]
            order = jnp.argsort(jnp.where(hit, jnp.arange(E, dtype=jnp.int32), E),
                                axis=-1).astype(jnp.int32)                             # hit first
            pos = jnp.arange(E, dtype=jnp.int32)[None, :]
            last_valid = jnp.take_along_axis(order, jnp.maximum(cnt - 1, 0)[:, None], axis=1)
            elist = jnp.where(pos < cnt[:, None], order, last_valid).astype(jnp.int32)
            elist = elist.reshape(-1)                                                  # [nb*E]
            h = moe_experts(hn, elist, cnt, scale_pad, shared,
                            lp['w_gate_up_e'], lp['w_down_e'], tm)
        else:
            # fused add+RMSNorm -> merged gate_up dense MLP
            h, residual = norm_mlp(attn_o, residual, lp['post_norm'],
                                   lp['w_gate_up'], lp['w_down'], eps, tm)

    out = add_rmsnorm_final(h, residual, params['final_norm'], eps, tm)
    return out.reshape(B, S, H)


# ----------------------------- main -------------------------------------------
if __name__ == "__main__":
    key = jax.random.PRNGKey(0)
    k_param, k_ids = jax.random.split(key)
    params = init_params(k_param, CFG)

    B, S = 2, 128
    input_ids = jax.random.randint(k_ids, (B, S), 1, CFG['vocab_size'])
    position_ids = jnp.broadcast_to(jnp.arange(S, dtype=jnp.int32)[None, :], (B, S))

    out = qwen2_moe_forward(params, input_ids, position_ids, CFG)
    jax.block_until_ready(out)
    assert out.shape == (B, S, CFG['hidden_size'])
    assert jnp.all(jnp.isfinite(out))
    print("KERNEL_OK")
</pallas_src>

<mosaic_0001>
module attributes {stable_mosaic.version = 11 : i64} {
  func.func @_norm_qkv_kernel(%arg0: i32, %arg1: memref<128x128xf32, #tpu.memory_space<vmem>>, %arg2: memref<128x128xf32, #tpu.memory_space<vmem>>, %arg3: memref<1x128xf32, #tpu.memory_space<vmem>>, %arg4: memref<128x1024xbf16, #tpu.memory_space<vmem>>, %arg5: memref<1x1024xf32, #tpu.memory_space<vmem>>, %arg6: memref<128x1024xbf16, #tpu.memory_space<vmem>>, %arg7: memref<128x128xf32, #tpu.memory_space<vmem>>) attributes {dimension_semantics = [#tpu.dimension_semantics<parallel>], iteration_bounds = array<i64: 2>, scalar_prefetch = 0 : i64, scratch_operands = 0 : i64, tpu.core_type = #tpu.core_type<tc>, window_params = [{transform_indices = @transform_0, window_bounds = array<i64: 128, 128>}, {transform_indices = @transform_1, window_bounds = array<i64: 128, 128>}, {pipeline_mode = #tpu.pipeline_mode<synchronous>, transform_indices = @transform_2, window_bounds = array<i64: 1, 128>}, {pipeline_mode = #tpu.pipeline_mode<synchronous>, transform_indices = @transform_3, window_bounds = array<i64: 128, 1024>}, {pipeline_mode = #tpu.pipeline_mode<synchronous>, transform_indices = @transform_4, window_bounds = array<i64: 1, 1024>}, {transform_indices = @transform_5, window_bounds = array<i64: 128, 1024>}, {transform_indices = @transform_6, window_bounds = array<i64: 128, 128>}]} {
    %c0 = arith.constant 0 : index
    %c0_0 = arith.constant 0 : index
    %0 = vector.load %arg1[%c0, %c0_0] : memref<128x128xf32, #tpu.memory_space<vmem>>, vector<128x128xf32>
    %c0_1 = arith.constant 0 : index
    %c0_2 = arith.constant 0 : index
    %1 = vector.load %arg2[%c0_1, %c0_2] : memref<128x128xf32, #tpu.memory_space<vmem>>, vector<128x128xf32>
    %2 = arith.addf %0, %1 : vector<128x128xf32>
    %c0_3 = arith.constant 0 : index
    %c0_4 = arith.constant 0 : index
    %3 = vector.load %arg7[%c0_3, %c0_4] : memref<128x128xf32, #tpu.memory_space<vmem>>, vector<128x128xf32>
    tpu.vector_store %arg7[%c0_3, %c0_4], %2 {strides = array<i32>} : memref<128x128xf32, #tpu.memory_space<vmem>>, vector<128x128xf32>,
    %4 = arith.mulf %2, %2 : vector<128x128xf32>
    %cst = arith.constant dense<0.000000e+00> : vector<128xf32>
    %5 = vector.multi_reduction <add>, %4, %cst [1] : vector<128x128xf32> to vector<128xf32>
    %6 = vector.shape_cast %5 : vector<128xf32> to vector<128x1xf32>
    %cst_5 = arith.constant 1.280000e+02 : f32
    %7 = vector.broadcast %cst_5 : f32 to vector<128x1xf32>
    %8 = arith.divf %6, %7 : vector<128x1xf32>
    %cst_6 = arith.constant 9.99999997E-7 : f32
    %9 = vector.broadcast %cst_6 : f32 to vector<128x1xf32>
    %10 = arith.addf %8, %9 : vector<128x1xf32>
    %11 = math.rsqrt %10 : vector<128x1xf32>
    %12 = vector.broadcast %11 : vector<128x1xf32> to vector<128x128xf32>
    %13 = arith.mulf %2, %12 : vector<128x128xf32>
    %c0_7 = arith.constant 0 : index
    %c0_8 = arith.constant 0 : index
    %14 = vector.load %arg3[%c0_7, %c0_8] : memref<1x128xf32, #tpu.memory_space<vmem>>, vector<1x128xf32>
    %15 = vector.broadcast %14 : vector<1x128xf32> to vector<128x128xf32>
    %16 = arith.mulf %13, %15 : vector<128x128xf32>
    %17 = arith.truncf %16 : vector<128x128xf32> to vector<128x128xbf16>
    %c0_9 = arith.constant 0 : index
    %c0_10 = arith.constant 0 : index
    %18 = vector.load %arg4[%c0_9, %c0_10] : memref<128x1024xbf16, #tpu.memory_space<vmem>>, vector<128x1024xbf16>
    %cst_11 = arith.constant dense<0.000000e+00> : vector<128x1024xf32>
    %19 = tpu.matmul %17, %18, %cst_11 {dimension_numbers = #tpu.dot_dimension_numbers<[1], [0], [0], [1], [0, 0, 1, 1], [], []>} : vector<128x128xbf16>, vector<128x1024xbf16>, vector<128x1024xf32> -> vector<128x1024xf32>
    %c0_12 = arith.constant 0 : index
    %c0_13 = arith.constant 0 : index
    %20 = vector.load %arg5[%c0_12, %c0_13] : memref<1x1024xf32, #tpu.memory_space<vmem>>, vector<1x1024xf32>
    %21 = vector.broadcast %20 : vector<1x1024xf32> to vector<128x1024xf32>
    %22 = arith.addf %19, %21 : vector<128x1024xf32>
    %23 = arith.truncf %22 : vector<128x1024xf32> to vector<128x1024xbf16>
    %c0_14 = arith.constant 0 : index
    %c0_15 = arith.constant 0 : index
    %24 = vector.load %arg6[%c0_14, %c0_15] : memref<128x1024xbf16, #tpu.memory_space<vmem>>, vector<128x1024xbf16>
    tpu.vector_store %arg6[%c0_14, %c0_15], %23 {strides = array<i32>} : memref<128x1024xbf16, #tpu.memory_space<vmem>>, vector<128x1024xbf16>,
    return
  }
  func.func @transform_0(%arg0: i32) -> (i32, i32) {
    %c0_i32 = arith.constant 0 : i32
    %c0_i32_0 = arith.constant 0 : i32
    return %arg0, %c0_i32 : i32, i32
  }
  func.func @transform_1(%arg0: i32) -> (i32, i32) {
    %c0_i32 = arith.constant 0 : i32
    %c0_i32_0 = arith.constant 0 : i32
    return %arg0, %c0_i32 : i32, i32
  }
  func.func @transform_2(%arg0: i32) -> (i32, i32) {
    %c0_i32 = arith.constant 0 : i32
    %c0_i32_0 = arith.constant 0 : i32
    %c0_i32_1 = arith.constant 0 : i32
    return %c0_i32, %c0_i32_0 : i32, i32
  }
  func.func @transform_3(%arg0: i32) -> (i32, i32) {
    %c0_i32 = arith.constant 0 : i32
    %c0_i32_0 = arith.constant 0 : i32
    %c0_i32_1 = arith.constant 0 : i32
    return %c0_i32, %c0_i32_0 : i32, i32
  }
  func.func @transform_4(%arg0: i32) -> (i32, i32) {
    %c0_i32 = arith.constant 0 : i32
    %c0_i32_0 = arith.constant 0 : i32
    %c0_i32_1 = arith.constant 0 : i32
    return %c0_i32, %c0_i32_0 : i32, i32
  }
  func.func @transform_5(%arg0: i32) -> (i32, i32) {
    %c0_i32 = arith.constant 0 : i32
    %c0_i32_0 = arith.constant 0 : i32
    return %arg0, %c0_i32 : i32, i32
  }
  func.func @transform_6(%arg0: i32) -> (i32, i32) {
    %c0_i32 = arith.constant 0 : i32
    %c0_i32_0 = arith.constant 0 : i32
    return %arg0, %c0_i32 : i32, i32
  }
}

</mosaic_0001>

<bundles_post_ra>
// kernel: tpu_custom_call.1
= control target key start
LH: loop header
LB: loop body
LE: loop exit
PB: predicated region body
PF: predicated region fallthrough
CT: control target
= control target key end

     0   :  { %s3488_s0 = inlined_call_operand.hbm [shape: f32[256,128], index: 0, kind: input, shape index: {}]   ;;  %s3489_s1 = inlined_call_operand.hbm [shape: f32[256,128], index: 1, kind: input, shape index: {}]   ;;  %s3490_s2 = inlined_call_operand.vmem [shape: f32[1,128], index: 2, kind: input, shape index: {}]   ;;  %s3491_s3 = inlined_call_operand.hbm [shape: bf16[128,1024], index: 3, kind: input, shape index: {}]   ;;  %s3492_s4 = inlined_call_operand.hbm [shape: f32[1,1024], index: 4, kind: input, shape index: {}]   ;;  %s3493_s5 = inlined_call_operand.hbm [shape: bf16[256,1024], index: 5, kind: output, shape index: {0}]   ;;  %s3494_s6 = inlined_call_operand.hbm [shape: f32[256,128], index: 6, kind: output, shape index: {1}]  }
   0x1   :  { %3497 = sst [smem:[#allocation21_spill]] %s3488_s0 }
   0x2   :  { %3498 = sst [smem:[#allocation22_spill]] %s3491_s3 }
   0x3   :  { %3499 = sst [smem:[#allocation23_spill]] %s3492_s4 }
   0x4   :  { %12 = vsyncpa [#allocation3], 0 }
   0x5   :  { %14 = vsyncpa [#allocation3 + $0x1], 0 }
   0x6   :  { %15 = vsyncpa [#allocation6], 0 }
   0x7   :  { %17 = vsyncpa [#allocation6 + $0x1], 0 }
   0x8   :  { %18 = vsyncpa [#allocation9], 0 }
   0x9   :  { %19 = vsyncpa [#allocation4], 0 }
   0xa   :  { %21 = vsyncpa [#allocation4 + $0x1], 0 }
   0xb   :  { %22 = vsyncpa [#allocation12], 0 }
   0xc   :  { %24 = vsyncpa [#allocation12 + $0x1], 0  ;;  %s2581_s21 = smov 0   ;;  %s2583_s22 = smov 0  }
   0xd   :  { %s2585_s23 = smov 0   ;;  %s2587_s24 = smov 0  }
   0xe LB: > { %3500 = sst [smem:[#allocation19_spill]] %s2529_s23  ;;  %s2602_s25 = sadd.s32 4294967295, %s2533_s24   ;;  %s2533_s24 = sphi %s2587_s24, %s3542_s24   ;;  %s2529_s23 = sphi %s2585_s23, %s3539_s23   ;;  %s2525_s22 = sphi %s2583_s22, %s3541_s22   ;;  %s2521_s21 = sphi %s2581_s21, %s3540_s21  }
   0xf   : > { %s1824_s26 = sadd.s32 4294967294, %s2533_s24   ;;  %p50_p0 = scmp.ne.s32.totalorder %s2525_s22, %s2521_s21 }
  0x10   : > { %p51_p1 = scmp.eq.s32.totalorder %s2602_s25, 0  ;;  %p163_p2 = scmp.eq.s32.totalorder %s2602_s25, 1 }
  0x11   : > { %p169_p3 = scmp.eq.s32.totalorder %s1824_s26, 1  ;;  %p1825_p5 = scmp.ge.s32.totalorder %s2533_s24, 1 }
  0x12   : > { %p2611_p4 = por %p51_p1, %p50_p0  ;;  %p202_p7 = scmp.lt.s32.totalorder %s2533_s24, 3 }
  0x13   : > { %p2616_p6 = por %p169_p3, %p50_p0  ;;  %s3503_s3 = sld [smem:[#allocation22_spill]] }
  0x14   : > { %p2624_p8 = pnand %p1825_p5, %p202_p7  ;;  %s2535_s9 = smov [#allocation7]  }
  0x15   : > { %s218_s10 = sshll.u32 %s2535_s9, 4  ;;  %s3505_s4 = sld [smem:[#allocation23_spill]]  ;;  %s219_s10 = int_to_ptr.vmem [resolvable:$true] %s218_s10 }
  0x16   : > { %p2192_p9 = pneg %p2624_p8  ;;  %s2536_s14 = smov 512  }
  0x17   : > { %s2537_s15 = smov 32   ;;  %s2538_s16 = smov [#allocation8]  }
  0x18   : > { %p2193_p10 = pnand %p2192_p9, %p51_p1  ;;  %s233_s17 = sshll.u32 %s2538_s16, 4  ;;  %s234_s17 = int_to_ptr.vmem [resolvable:$true] %s233_s17 }
  0x19   : > { %s216_s7 = sshll.u32 %s3503_s3, 4  ;;  %s2637_s18 = sadd.s32 1, %s2533_s24   ;;  %s217_s7 = int_to_ptr.hbm [resolvable:$true] %s216_s7 }
  0x1a   : > { %2195 = dma.hbm_to_vmem [thread:$0]  (!%p2193_p10), %s217_s7, 8192, %s219_s10, [#allocation6], %s2536_s14, %s2536_s14, %s2537_s15  }
  0x1b   : > { %s231_s13 = sshll.u32 %s3505_s4, 4  ;;  %s37_s19 = sadd.s32 1, %s2529_s23  ;;  %s232_s13 = int_to_ptr.hbm [resolvable:$true] %s231_s13 }
  0x1c   : > { %2198 = dma.hbm_to_vmem [thread:$0]  (!%p2193_p10), %s232_s13, 128, %s234_s17, [#allocation9]  }
  0x1d   : > { %s34_s20 = ssub.s32 %s2533_s24, %s2637_s18  ;;  %p44_p12 = scmp.ne.s32.totalorder %s2529_s23, %s2525_s22 }
  0x1e   : > { %p35_p13 = scmp.eq.s32.totalorder %s34_s20, 0  ;;  %p45_p0 = scmp.eq.s32.totalorder %s2533_s24, 0 }
  0x1f   : > { %p2647_p3 = por %p163_p2, %p44_p12  ;;  %p2215_p5 = scmp.lt.s32.totalorder %s2533_s24, 2 }
  0x20   : > { %s2653_s29 = scalar_select %p35_p13, %s2529_s23, %s37_s19  }
  0x21   : > { %p46_p7 = por %p45_p0, %p44_p12  ;;  %s244_s30 = sand.u32 1, %s2529_s23  }
  0x22   : > { %3507 = sst [smem:[#allocation20_spill]] %s2653_s29  ;;  %s2656_s7 = sshll.u32 %s244_s30, 7 }
  0x23   : > { %s3495_s9 = sshll.u32 %s2533_s24, 7  ;;  %s3508_s0 = sld [smem:[#allocation21_spill]] }
  0x24   : > { %s248_s13 = scalar_lea.vmem [#allocation2], %s2656_s7  ;;  %p2665_p2 = pnand %p2215_p5, %p46_p7 }
  0x25   : > { %s256_s14 = sshll.u32 %s248_s13, 4  ;;  %s245_s17 = scalar_lea.sflag [#allocation3], %s244_s30  ;;  %s257_s14 = int_to_ptr.vmem [resolvable:$true] %s256_s14 }
  0x26   : > { %p2367_p10 = pneg %p2665_p2 }
  0x29   : > { %s253_s12 = scalar_lea.hbm %s3508_s0, %s3495_s9 }
  0x2a   : > { %s254_s15 = sshll.u32 %s253_s12, 4  ;;  %s2370_s12 = scalar_lea.hbm %s3508_s0, 256  ;;  %s255_s15 = int_to_ptr.hbm [resolvable:$true] %s254_s15 }
  0x2b   : > { %s2363_s19 = sshra.s32 %s255_s15, 4  ;;  %s2364_s19 = int_to_ptr.hbm [resolvable:$true] %s2363_s19 }
  0x2c   : > { %s2365_s20 = scalar_lea.hbm %s2364_s19, 128  ;;  %p2371_p0 = scmp.lt.s32.totalorder %s2364_s19, %s3508_s0 }
  0x2d   : > { %p2366_p9 = scmp.ne.s32.totalorder %s2364_s19, %s2365_s20  ;;  %p2372_p5 = scmp.lt.s32.totalorder %s2370_s12, %s2365_s20 }
  0x2f   : > { %p2368_p12 = pnand %p2367_p10, %p2366_p9  ;;  %p2373_p7 = por %p2372_p5, %p2371_p0 }
  0x31   : > { %p2369_p13 = pneg %p2368_p12 }
  0x33   : > { %p2374_p11 = pnand %p2373_p7, %p2369_p13 }
  0x35   : > { %2377 = shalt.err (!%p2374_p11)
}
  0x36   : > { %s2539_s30 = smov 128   ;;  %s2540_s3 = smov 8  }
  0x37   : > { %2202 = dma.hbm_to_vmem [thread:$0]  (!%p2665_p2), %s255_s15, 2048, %s257_s14, %s245_s17, %s2539_s30, %s2539_s30, %s2540_s3  }
  0x38   : > { %s3510_s4 = sshll.u32 %s2533_s24, 7  ;;  %s270_s9 = scalar_lea.vmem [#allocation5], %s2656_s7 }
  0x39   : > { %s275_s29 = scalar_lea.hbm %s3489_s1, %s3510_s4  ;;  %s278_s19 = sshll.u32 %s270_s9, 4  ;;  %s279_s19 = int_to_ptr.vmem [resolvable:$true] %s278_s19 }
  0x3a   : > { %s276_s20 = sshll.u32 %s275_s29, 4  ;;  %s266_s12 = sand.u32 1, %s2533_s24   ;;  %s277_s20 = int_to_ptr.hbm [resolvable:$true] %s276_s20 }
  0x3b   : > { %s267_s13 = scalar_lea.sflag [#allocation6], %s266_s12  ;;  %s2393_s0 = sshra.s32 %s277_s20, 4  ;;  %s2394_s0 = int_to_ptr.hbm [resolvable:$true] %s2393_s0 }
  0x3c   : > { %s2395_s23 = scalar_lea.hbm %s2394_s0, 128  ;;  %s2400_s17 = scalar_lea.hbm %s3489_s1, 256 }
  0x3d   : > { %p2396_p11 = scmp.ne.s32.totalorder %s2394_s0, %s2395_s23  ;;  %p2401_p13 = scmp.lt.s32.totalorder %s2394_s0, %s3489_s1 }
  0x3e   : > { %p2402_p0 = scmp.lt.s32.totalorder %s2400_s17, %s2395_s23 }
  0x3f   : > { %p2398_p9 = pnand %p2396_p11, %p2367_p10 }
  0x40   : > { %p2403_p5 = por %p2402_p0, %p2401_p13 }
  0x41   : > { %p2399_p12 = pneg %p2398_p9 }
  0x43   : > { %p2404_p7 = pnand %p2403_p5, %p2399_p12 }
  0x45   : > { %2407 = shalt.err (!%p2404_p7)
}
  0x46   : > { %2205 = dma.hbm_to_vmem [thread:$0]  (!%p2665_p2), %s277_s20, 2048, %s279_s19, %s267_s13, %s2539_s30, %s2539_s30, %s2540_s3  }
  0x47   : > { %290 = sbr.rel (%p2624_p8) target bundleno = 632 (0x278), region = 40  ;;  %s2703_s29 = sand.u32 (!%p2624_p8), 1, %s2525_s22  }
  0x48   : > { %s1836_s10 = sshll.u32 (!%p2624_p8), %s2703_s29, 7  ;;  %s293_s11 = scalar_lea.sflag (!%p2624_p8), [#allocation3], %s2703_s29 }
  0x49   : > { %s2707_s9 = scalar_lea.vmem (!%p2624_p8), [#allocation2], %s1836_s10 }
  0x4c   : > { %2496 = dma.done.wait (%p2611_p4), %s293_s11, 2048  }
  0x4d   : > { %2498 = vsyncadd (%p2611_p4), %s293_s11, 4294965248  ;;  %s302_s0 = sand.u32 1, %s2602_s25   ;;  %s2714_s23 = scalar_lea.vmem [#allocation5], %s1836_s10 }
  0x4e   : > { %s303_s3 = scalar_lea.sflag [#allocation6], %s302_s0 }
  0x4f   : > { %2500 = dma.done.wait (%p2611_p4), %s303_s3, 2048  }
  0x50   : > { %2502 = vsyncadd (%p2611_p4), %s303_s3, 4294965248 }
  0x51   : > { %2504 = dma.done.wait (%p51_p1), [#allocation6], 8192  }
  0x52   : > { %2506 = vsyncadd (%p51_p1), [#allocation6], 4294959104 }
  0x53   : > { %2508 = dma.done.wait (%p51_p1), [#allocation9], 128  }
  0x54   : > { %2510 = vsyncadd (%p51_p1), [#allocation9], 4294967168  ;;  %v362_v0 = vld [vmem:[%s2707_s9 + $0x10] sm:$0xff]  ;;  %v360_v2 = vld [vmem:[%s2707_s9] sm:$0xff]  ;;  %s2743_s27 = scalar_lea.vmem [#allocation11], %s1836_s10  ;;  %s1840_s30 = sshll.u32 %s2703_s29, 9 }
  0x55   : > { %v378_v1 = vld [vmem:[%s2714_s23 + $0x10] sm:$0xff]  ;;  %v376_v4 = vld [vmem:[%s2714_s23] sm:$0xff]  ;;  %v363_v5 = vld [vmem:[%s2707_s9 + $0x18] sm:$0xff]  ;;  %s3206_s19 = scalar_lea.vmem [#allocation10], %s1840_s30  ;;  %s2175_s20 = sshll.u32 %s2602_s25, 7 }
  0x56   : > { %v2731_v3 = vadd.f32 %v378_v1, %v362_v0  ;;  %v379_v6 = vld [vmem:[%s2714_s23 + $0x18] sm:$0xff]  ;;  %v2736_v7 = vadd.f32 %v376_v4, %v360_v2  ;;  %v361_v8 = vld [vmem:[%s2707_s9 + $0x8] sm:$0xff]  ;;  %v364_v10 = vld [vmem:[%s2707_s9 + $0x20] sm:$0xff]  ;;  %s1672_s14 = scalar_lea.hbm %s3494_s6, %s2175_s20  ;;  %s1673_s15 = sshll.u32 %s2743_s27, 4  ;;  %s1674_s15 = int_to_ptr.vmem [resolvable:$true] %s1673_s15 }
  0x57   : > { %v377_v9 = vld [vmem:[%s2714_s23 + $0x8] sm:$0xff]  ;;  %v2747_v12 = vadd.f32 %v379_v6, %v363_v5  ;;  %v380_v13 = vld [vmem:[%s2714_s23 + $0x20] sm:$0xff]  ;;  %v367_v19 = vld [vmem:[%s2707_s9 + $0x38] sm:$0xff]  ;;  %s1675_s17 = sshll.u32 %s1672_s14, 4  ;;  %s1643_s4 = scalar_lea.sflag [#allocation12], %s2703_s29  ;;  %s1676_s17 = int_to_ptr.hbm [resolvable:$true] %s1675_s17 }
  0x58   : > { %v426_v11 = vmul.f32 %v2731_v3, %v2731_v3  ;;  %410 = vst [vmem:[%s2743_s27 + $0x10] sm:$0xff] %v2731_v3  ;;  %v365_v14 = vld [vmem:[%s2707_s9 + $0x28] sm:$0xff]  ;;  %v424_v16 = vmul.f32 %v2736_v7, %v2736_v7  ;;  %v2756_v17 = vadd.f32 %v377_v9, %v361_v8  ;;  %v2758_v18 = vadd.f32 %v380_v13, %v364_v10  ;;  %v383_v20 = vld [vmem:[%s2714_s23 + $0x38] sm:$0xff]  ;;  %v366_v21 = vld [vmem:[%s2707_s9 + $0x30] sm:$0xff]  ;;  %s2437_s7 = sshra.s32 %s1676_s17, 4  ;;  %s2443_s0 = scalar_lea.hbm %s3494_s6, 256  ;;  %s2438_s7 = int_to_ptr.hbm [resolvable:$true] %s2437_s7 }
  0x59   : > { %v381_v15 = vld [vmem:[%s2714_s23 + $0x28] sm:$0xff]  ;;  %408 = vst [vmem:[%s2743_s27] sm:$0xff] %v2736_v7  ;;  %v382_v22 = vld [vmem:[%s2714_s23 + $0x30] sm:$0xff]  ;;  %v368_v25 = vld [vmem:[%s2707_s9 + $0x40] sm:$0xff]  ;;  %v2776_v27 = vadd.f32 %v383_v20, %v367_v19  ;;  %v427_v33 = vmul.f32 %v2747_v12, %v2747_v12  ;;  %v2541_v9 = vmov 128.0   ;;  %s2439_s10 = scalar_lea.hbm %s2438_s7, 128  ;;  %p2444_p2 = scmp.lt.s32.totalorder %s2438_s7, %s3494_s6 }
  0x5a   : > { %444 = vadd.xlane.f32.xlu1 %v426_v11  ;;  %411 = vst [vmem:[%s2743_s27 + $0x18] sm:$0xff] %v2747_v12  ;;  %440 = vadd.xlane.f32.xlu0 %v424_v16  ;;  %v428_v23 = vmul.f32 %v2758_v18, %v2758_v18  ;;  %v2770_v24 = vadd.f32 %v381_v15, %v365_v14  ;;  %v384_v26 = vld [vmem:[%s2714_s23 + $0x40] sm:$0xff]  ;;  %v369_v28 = vld [vmem:[%s2707_s9 + $0x48] sm:$0xff]  ;;  %v371_v31 = vld [vmem:[%s2707_s9 + $0x58] sm:$0xff]  ;;  %2263 = vrcp.f32 %v2541_v9  ;;  %p2440_p1 = scmp.ne.s32.totalorder %s2438_s7, %s2439_s10  ;;  %p2445_p10 = scmp.lt.s32.totalorder %s2443_s0, %s2439_s10 }
  0x5b   : > { %409 = vst [vmem:[%s2743_s27 + $0x8] sm:$0xff] %v2756_v17  ;;  %v385_v29 = vld [vmem:[%s2714_s23 + $0x48] sm:$0xff]  ;;  %v2782_v30 = vadd.f32 %v382_v22, %v366_v21  ;;  %v387_v32 = vld [vmem:[%s2714_s23 + $0x58] sm:$0xff]  ;;  %v2790_v34 = vadd.f32 %v384_v26, %v368_v25  ;;  %v370_v35 = vld [vmem:[%s2707_s9 + $0x50] sm:$0xff]  ;;  %v425_v37 = vmul.f32 %v2756_v17, %v2756_v17  ;;  %v431_v54 = vmul.f32 %v2776_v27, %v2776_v27 }
  0x5c   : > { %412 = vst [vmem:[%s2743_s27 + $0x20] sm:$0xff] %v2758_v18  ;;  %448 = vadd.xlane.f32.xlu2 %v428_v23  ;;  %v386_v36 = vld [vmem:[%s2714_s23 + $0x50] sm:$0xff]  ;;  %v2798_v38 = vadd.f32 %v385_v29, %v369_v28  ;;  %v373_v39 = vld [vmem:[%s2707_s9 + $0x68] sm:$0xff]  ;;  %v403_v41 = vadd.f32 %v387_v32, %v371_v31  ;;  %v372_v42 = vld [vmem:[%s2707_s9 + $0x60] sm:$0xff]  ;;  %v429_v44 = vmul.f32 %v2770_v24, %v2770_v24  ;;  %p2441_p4 = pnand %p2440_p1, %p2647_p3  ;;  %p2446_p11 = por %p2445_p10, %p2444_p2 }
  0x5d   : > { %413 = vst [vmem:[%s2743_s27 + $0x28] sm:$0xff] %v2770_v24  ;;  %v389_v40 = vld [vmem:[%s2714_s23 + $0x68] sm:$0xff]  ;;  %v388_v43 = vld [vmem:[%s2714_s23 + $0x60] sm:$0xff]  ;;  %v402_v45 = vadd.f32 %v386_v36, %v370_v35  ;;  %v374_v46 = vld [vmem:[%s2707_s9 + $0x70] sm:$0xff]  ;;  %v430_v55 = vmul.f32 %v2782_v30, %v2782_v30  ;;  %v432_v56 = vmul.f32 %v2790_v34, %v2790_v34 }
  0x5e   : > { %415 = vst [vmem:[%s2743_s27 + $0x38] sm:$0xff] %v2776_v27  ;;  %v390_v47 = vld [vmem:[%s2714_s23 + $0x70] sm:$0xff]  ;;  %v405_v48 = vadd.f32 %v389_v40, %v373_v39  ;;  %v375_v49 = vld [vmem:[%s2707_s9 + $0x78] sm:$0xff]  ;;  %v404_v51 = vadd.f32 %v388_v43, %v372_v42  ;;  %v433_v58 = vmul.f32 %v2798_v38, %v2798_v38  ;;  %v435_v59 = vmul.f32 %v403_v41, %v403_v41  ;;  %v2068_v0 = vld [vmem:[#allocation7 + $0x1c0] sm:$0xf]  ;;  %p2442_p8 = pneg %p2441_p4 }
  0x5f   : > { %414 = vst [vmem:[%s2743_s27 + $0x30] sm:$0xff] %v2782_v30  ;;  %v391_v50 = vld [vmem:[%s2714_s23 + $0x78] sm:$0xff]  ;;  %v406_v52 = vadd.f32 %v390_v47, %v374_v46  ;;  %v434_v57 = vmul.f32 %v402_v45, %v402_v45  ;;  %v2169_v1 = vld [vmem:[#allocation7 + $0x1dc] sm:$0xf0]  ;;  %v2165_v2 = vld [vmem:[#allocation7 + $0x1c4] sm:$0xf] }
  0x60   : > { %416 = vst [vmem:[%s2743_s27 + $0x40] sm:$0xff] %v2790_v34  ;;  %v407_v53 = vadd.f32 %v391_v50, %v375_v49  ;;  %v437_v60 = vmul.f32 %v405_v48, %v405_v48  ;;  %v436_v61 = vmul.f32 %v404_v51, %v404_v51  ;;  %v2069_v4 = vor.u32 %v2169_v1, %v2068_v0  ;;  %v2070_v5 = vld [vmem:[#allocation7 + $0x1e0] sm:$0xf0]  ;;  %v2076_v6 = vld [vmem:[#allocation7 + $0x1c8] sm:$0xf]  ;;  %p2447_p9 = pnand %p2446_p11, %p2442_p8 }
  0x61   : > { %417 = vst [vmem:[%s2743_s27 + $0x48] sm:$0xff] %v2798_v38  ;;  %v438_v62 = vmul.f32 %v406_v52, %v406_v52  ;;  %v2170_v8 = vld [vmem:[#allocation7 + $0x1e4] sm:$0xf0]  ;;  %v2073_v10 = vor.u32 %v2165_v2, %v2070_v5  ;;  %v2166_v13 = vld [vmem:[#allocation7 + $0x1cc] sm:$0xf] }
  0x62   : > { %446 = vadd.xlane.f32.xlu1 %v427_v33  ;;  %419 = vst [vmem:[%s2743_s27 + $0x58] sm:$0xff] %v403_v41  ;;  %442 = vadd.xlane.f32.xlu0 %v425_v37  ;;  %v439_v63 = vmul.f32 %v407_v53, %v407_v53  ;;  %v2077_v11 = vor.u32 %v2170_v8, %v2076_v6  ;;  %v2078_v14 = vld [vmem:[#allocation7 + $0x1e8] sm:$0xf0]  ;;  %v2036_v16 = vld [vmem:[#allocation7 + $0x180] sm:$0xf]  ;;  %v2828_v33 = vpop.eup %2263 }
  0x63   : > { %418 = vst [vmem:[%s2743_s27 + $0x50] sm:$0xff] %v402_v45  ;;  %1117 = vmatpush.bf16.msra.mxu0 %v2069_v4  ;;  %v2081_v15 = vor.u32 %v2166_v13, %v2078_v14  ;;  %1166 = vmatpush.bf16.msra.mxu1 %v2073_v10  ;;  %v2161_v19 = vld [vmem:[#allocation7 + $0x19c] sm:$0xf0]  ;;  %v2157_v20 = vld [vmem:[#allocation7 + $0x184] sm:$0xf]  ;;  %v473_v47 = vmul.f32 128.0, %v2828_v33  ;;  %vm477_vm0 = vweird.f32 %v2828_v33 }
  0x64   : > { %421 = vst [vmem:[%s2743_s27 + $0x68] sm:$0xff] %v405_v48  ;;  %450 = vadd.xlane.f32.xlu2 %v429_v44  ;;  %1215 = vmatpush.bf16.msra.mxu2 %v2077_v11  ;;  %v2037_v21 = vor.u32 %v2161_v19, %v2036_v16  ;;  %v2038_v22 = vld [vmem:[#allocation7 + $0x1a0] sm:$0xf0]  ;;  %v2044_v23 = vld [vmem:[#allocation7 + $0x188] sm:$0xf] }
  0x65   : > { %420 = vst [vmem:[%s2743_s27 + $0x60] sm:$0xff] %v404_v51  ;;  %1264 = vmatpush.bf16.msra.mxu3 %v2081_v15  ;;  %v2162_v25 = vld [vmem:[#allocation7 + $0x1a4] sm:$0xf0]  ;;  %v2041_v26 = vor.u32 %v2157_v20, %v2038_v22  ;;  %v2158_v29 = vld [vmem:[#allocation7 + $0x18c] sm:$0xf] }
  0x66   : > { %422 = vst [vmem:[%s2743_s27 + $0x70] sm:$0xff] %v406_v52  ;;  %v2045_v28 = vor.u32 %v2162_v25, %v2044_v23  ;;  %v2046_v31 = vld [vmem:[#allocation7 + $0x1a8] sm:$0xf0]  ;;  %v2004_v35 = vld [vmem:[#allocation7 + $0x140] sm:$0xf] }
  0x67   : > { %423 = vst [vmem:[%s2743_s27 + $0x78] sm:$0xff] %v407_v53  ;;  %1118 = vmatpush.bf16.msra.mxu0 %v2037_v21  ;;  %v2049_v32 = vor.u32 %v2158_v29, %v2046_v31  ;;  %1167 = vmatpush.bf16.msra.mxu1 %v2041_v26  ;;  %v2153_v36 = vld [vmem:[#allocation7 + $0x15c] sm:$0xf0]  ;;  %v2149_v37 = vld [vmem:[#allocation7 + $0x144] sm:$0xf] }
  0x68   : > { %1216 = vmatpush.bf16.msra.mxu2 %v2045_v28  ;;  %v2005_v39 = vor.u32 %v2153_v36, %v2004_v35  ;;  %v2006_v40 = vld [vmem:[#allocation7 + $0x160] sm:$0xf0]  ;;  %v2012_v41 = vld [vmem:[#allocation7 + $0x148] sm:$0xf]  ;;  %v2150_v45 = vld [vmem:[#allocation7 + $0x14c] sm:$0xf] }
  0x69   : > { %1265 = vmatpush.bf16.msra.mxu3 %v2049_v32  ;;  %v2154_v42 = vld [vmem:[#allocation7 + $0x164] sm:$0xf0]  ;;  %v2009_v43 = vor.u32 %v2149_v37, %v2006_v40  ;;  %v2014_v46 = vld [vmem:[#allocation7 + $0x168] sm:$0xf0]  ;;  %v1972_v49 = vld [vmem:[#allocation7 + $0x100] sm:$0xf] }
  0x6a   : > { %454 = vadd.xlane.f32.xlu1 %v431_v54  ;;  %452 = vadd.xlane.f32.xlu0 %v430_v55  ;;  %v2013_v44 = vor.u32 %v2154_v42, %v2012_v41  ;;  %v2017_v48 = vor.u32 %v2150_v45, %v2014_v46  ;;  %v2145_v50 = vld [vmem:[#allocation7 + $0x11c] sm:$0xf0]  ;;  %v2141_v51 = vld [vmem:[#allocation7 + $0x104] sm:$0xf]  ;;  %v1980_v54 = vld [vmem:[#allocation7 + $0x108] sm:$0xf] }
  0x6b   : > { %1119 = vmatpush.bf16.msra.mxu0 %v2005_v39  ;;  %1168 = vmatpush.bf16.msra.mxu1 %v2009_v43  ;;  %v1973_v52 = vor.u32 %v2145_v50, %v1972_v49  ;;  %v1974_v53 = vld [vmem:[#allocation7 + $0x120] sm:$0xf0]  ;;  %v2146_v55 = vld [vmem:[#allocation7 + $0x124] sm:$0xf0]  ;;  %v2134_v9 = vld [vmem:[#allocation7 + $0xcc] sm:$0xf] }
  0x6c   : > { %456 = vadd.xlane.f32.xlu2 %v432_v56  ;;  %1217 = vmatpush.bf16.msra.mxu2 %v2013_v44  ;;  %v1977_v56 = vor.u32 %v2141_v51, %v1974_v53  ;;  %v2133_v0 = vld [vmem:[#allocation7 + $0xc4] sm:$0xf]  ;;  %v1948_v4 = vld [vmem:[#allocation7 + $0xc8] sm:$0xf]  ;;  %v1950_v10 = vld [vmem:[#allocation7 + $0xe8] sm:$0xf0] }
  0x6d   : > { %1266 = vmatpush.bf16.msra.mxu3 %v2017_v48  ;;  %v1942_v2 = vld [vmem:[#allocation7 + $0xe0] sm:$0xf0]  ;;  %v2138_v5 = vld [vmem:[#allocation7 + $0xe4] sm:$0xf0]  ;;  %v1953_v13 = vor.u32 %v2134_v9, %v1950_v10  ;;  %v1908_v14 = vld [vmem:[#allocation7 + $0x80] sm:$0xf] }
  0x6e   : > { %v1945_v6 = vor.u32 %v2133_v0, %v1942_v2  ;;  %v1949_v8 = vor.u32 %v2138_v5, %v1948_v4  ;;  %v2129_v15 = vld [vmem:[#allocation7 + $0x9c] sm:$0xf0]  ;;  %v2125_v16 = vld [vmem:[#allocation7 + $0x84] sm:$0xf]  ;;  %v1916_v21 = vld [vmem:[#allocation7 + $0x88] sm:$0xf] }
  0x6f   : > { %1120 = vmatpush.bf16.msra.mxu0 %v1973_v52  ;;  %1169 = vmatpush.bf16.msra.mxu1 %v1977_v56  ;;  %v1909_v19 = vor.u32 %v2129_v15, %v1908_v14  ;;  %v1910_v20 = vld [vmem:[#allocation7 + $0xa0] sm:$0xf0]  ;;  %v2130_v22 = vld [vmem:[#allocation7 + $0xa4] sm:$0xf0]  ;;  %v2126_v26 = vld [vmem:[#allocation7 + $0x8c] sm:$0xf] }
  0x70   : > { %v1913_v23 = vor.u32 %v2125_v16, %v1910_v20  ;;  %v1917_v25 = vor.u32 %v2130_v22, %v1916_v21  ;;  %v1918_v28 = vld [vmem:[#allocation7 + $0xa8] sm:$0xf0]  ;;  %v1876_v32 = vld [vmem:[#allocation7 + $0x40] sm:$0xf]  ;;  %v2117_v36 = vld [vmem:[#allocation7 + $0x44] sm:$0xf] }
  0x71   : > { %v1921_v31 = vor.u32 %v2126_v26, %v1918_v28  ;;  %v2121_v35 = vld [vmem:[#allocation7 + $0x5c] sm:$0xf0]  ;;  %v1878_v39 = vld [vmem:[#allocation7 + $0x60] sm:$0xf0]  ;;  %v1884_v40 = vld [vmem:[#allocation7 + $0x48] sm:$0xf] }
  0x72   : > { %460 = vadd.xlane.f32.xlu1 %v434_v57  ;;  %458 = vadd.xlane.f32.xlu0 %v433_v58  ;;  %v1981_v57 = vor.u32 %v2146_v55, %v1980_v54  ;;  %v2142_v58 = vld [vmem:[#allocation7 + $0x10c] sm:$0xf]  ;;  %v1877_v37 = vor.u32 %v2121_v35, %v1876_v32  ;;  %v2122_v41 = vld [vmem:[#allocation7 + $0x64] sm:$0xf0]  ;;  %v1881_v42 = vor.u32 %v2117_v36, %v1878_v39  ;;  %v1844_v49 = vld [vmem:[#allocation7] sm:$0xf] }
  0x73   : > { %1170 = vmatpush.bf16.msra.mxu1 %v1945_v6  ;;  %v1885_v43 = vor.u32 %v2122_v41, %v1884_v40  ;;  %v2118_v44 = vld [vmem:[#allocation7 + $0x4c] sm:$0xf]  ;;  %v2113_v50 = vld [vmem:[#allocation7 + $0x1c] sm:$0xf0]  ;;  %v2109_v51 = vld [vmem:[#allocation7 + $0x4] sm:$0xf] }
  0x74   : > { %462 = vadd.xlane.f32.xlu2 %v435_v59  ;;  %v1982_v59 = vld [vmem:[#allocation7 + $0x128] sm:$0xf0]  ;;  %1218 = vmatpush.bf16.msra.mxu2 %v1981_v57  ;;  %v1845_v53 = vor.u32 %v2113_v50, %v1844_v49  ;;  %v1846_v54 = vld [vmem:[#allocation7 + $0x20] sm:$0xf0]  ;;  %v1852_v55 = vld [vmem:[#allocation7 + $0x8] sm:$0xf] }
  0x75   : > { %v1886_v45 = vld [vmem:[#allocation7 + $0x68] sm:$0xf0]  ;;  %v2114_v56 = vld [vmem:[#allocation7 + $0x24] sm:$0xf0]  ;;  %v2172_v2 = vld [vmem:[#allocation7 + $0x1f4] sm:$0xf0] }
  0x76   : > { %v2168_v4 = vld [vmem:[#allocation7 + $0x1dc] sm:$0xf]  ;;  %v2084_v22 = vld [vmem:[#allocation7 + $0x1d0] sm:$0xf]  ;;  %v2060_v50 = vld [vmem:[#allocation7 + $0x198] sm:$0xf] }
  0x77   : > { %1171 = vmatpush.bf16.msra.mxu1 %v1913_v23  ;;  %v2094_v9 = vld [vmem:[#allocation7 + $0x1f8] sm:$0xf0]  ;;  %v2171_v23 = vld [vmem:[#allocation7 + $0x1ec] sm:$0xf0] }
  0x78   : > { %1219 = vmatpush.bf16.msra.mxu2 %v1949_v8  ;;  %v2085_v28 = vor.u32 %v2171_v23, %v2084_v22 }
  0x7a   : > { %466 = vadd.xlane.f32.xlu1 %v437_v60  ;;  %464 = vadd.xlane.f32.xlu0 %v436_v61  ;;  %v474_v60 = vsub.f32 1.0, %v473_v47  ;;  %v1985_v61 = vor.u32 %v2142_v58, %v1982_v59  ;;  %v1889_v47 = vor.u32 %v2118_v44, %v1886_v45  ;;  %v1849_v58 = vor.u32 %v2109_v51, %v1846_v54  ;;  %v2164_v51 = vld [vmem:[#allocation7 + $0x1b4] sm:$0xf0] }
  0x7b   : > { %1172 = vmatpush.bf16.msra.mxu1 %v1881_v42  ;;  %v1853_v59 = vor.u32 %v2114_v56, %v1852_v55 }
  0x7c   : > { %468 = vadd.xlane.f32.xlu2 %v438_v62  ;;  %v1940_v62 = vld [vmem:[#allocation7 + $0xc0] sm:$0xf]  ;;  %1267 = vmatpush.bf16.msra.mxu3 %v1985_v61  ;;  %v475_v11 = vmul.f32 %v2828_v33, %v474_v60  ;;  %v1854_v60 = vld [vmem:[#allocation7 + $0x28] sm:$0xf0] }
  0x7d   : > { %1220 = vmatpush.bf16.msra.mxu2 %v1917_v25  ;;  %v2167_v25 = vld [vmem:[#allocation7 + $0x1d4] sm:$0xf] }
  0x7e   : > { %v476_v29 = vadd.f32 %v2828_v33, %v475_v11 }
  0x7f   : > { %1173 = vmatpush.bf16.msra.mxu1 %v1849_v58 }
  0x80   : > { %1268 = vmatpush.bf16.msra.mxu3 %v1953_v13  ;;  %v2835_v46 = vsel %vm477_vm0, %v2828_v33, %v476_v29  ;;  %v2110_v33 = vld [vmem:[#allocation7 + $0xc] sm:$0xf]  ;;  %v2097_v13 = vor.u32 %v2168_v4, %v2094_v9  ;;  %v2086_v29 = vld [vmem:[#allocation7 + $0x1f0] sm:$0xf0] }
  0x81   : > { %1221 = vmatpush.bf16.msra.mxu2 %v1885_v43  ;;  %v1857_v61 = vor.u32 %v2110_v33, %v1854_v60  ;;  %v2089_v32 = vor.u32 %v2167_v25, %v2086_v29  ;;  %v2061_v33 = vor.u32 %v2164_v51, %v2060_v50 }
  0x82   : > { %470 = vadd.xlane.f32.xlu0 %v439_v63  ;;  %v2137_v63 = vld [vmem:[#allocation7 + $0xdc] sm:$0xf0] }
  0x83   : > { %v1941_v1 = vor.u32 %v2137_v63, %v1940_v62  ;;  %1362 = vmatpush.bf16.msrb.mxu1 %v2089_v32 }
  0x84   : > { %1269 = vmatpush.bf16.msra.mxu3 %v1921_v31 }
  0x85   : > { %1121 = vmatpush.bf16.msra.mxu0 %v1941_v1  ;;  %1222 = vmatpush.bf16.msra.mxu2 %v1853_v59  ;;  %v2092_v1 = vld [vmem:[#allocation7 + $0x1d8] sm:$0xf] }
  0x86   : > { %v2093_v8 = vor.u32 %v2172_v2, %v2092_v1  ;;  %v2874_v1 = vld [vmem:[%s3490_s2] ss:$0 sm:$0xff] }
  0x88   : > { %1270 = vmatpush.bf16.msra.mxu3 %v1889_v47 }
  0x89   : > { %1122 = vmatpush.bf16.msra.mxu0 %v1909_v19  ;;  %1411 = vmatpush.bf16.msrb.mxu2 %v2093_v8 }
  0x8c   : > { %1271 = vmatpush.bf16.msra.mxu3 %v1857_v61  ;;  %v2052_v61 = vld [vmem:[#allocation7 + $0x190] sm:$0xf] }
  0x8d   : > { %1123 = vmatpush.bf16.msra.mxu0 %v1877_v37  ;;  %1412 = vmatpush.bf16.msrb.mxu2 %v2061_v33 }
  0x90   : > { %1460 = vmatpush.bf16.msrb.mxu3 %v2097_v13 }
  0x91   : > { %1124 = vmatpush.bf16.msra.mxu0 %v1845_v53  ;;  %v2062_v53 = vld [vmem:[#allocation7 + $0x1b8] sm:$0xf0] }
  0x95   : > { %1313 = vmatpush.bf16.msrb.mxu0 %v2085_v28 }
  0xcd   : > { %v445_v48 = vpop.xlane.xlu1 %444  ;;  %v441_v52 = vpop.xlane.xlu0 %440 }
  0xce   : > { %v479_v57 = vmul.f32 %v2835_v46, %v441_v52  ;;  %v481_v62 = vmul.f32 %v2835_v46, %v445_v48  ;;  %v2160_v52 = vld [vmem:[#allocation7 + $0x19c] sm:$0xf] }
  0xcf   : > { %v449_v0 = vpop.xlane.xlu2 %448  ;;  %v2065_v60 = vor.u32 %v2160_v52, %v2062_v53  ;;  %v2155_v53 = vld [vmem:[#allocation7 + $0x16c] sm:$0xf0] }
  0xd0   : > { %v495_v63 = vadd.f32 1e-06, %v479_v57  ;;  %v2839_v5 = vadd.f32 1e-06, %v481_v62  ;;  %v483_v36 = vmul.f32 %v2835_v46, %v449_v0  ;;  %v2163_v62 = vld [vmem:[#allocation7 + $0x1ac] sm:$0xf0] }
  0xd1   : > { %1461 = vmatpush.bf16.msrb.mxu3 %v2065_v60  ;;  %v2053_v4 = vor.u32 %v2163_v62, %v2052_v61 }
  0xd2   : > { %2265 = vrsqrt.f32 %v495_v63  ;;  %v2857_v45 = vadd.f32 1e-06, %v483_v36  ;;  %vm517_vm2 = vweird.f32 %v495_v63  ;;  %vm537_vm9 = vweird.f32 %v2839_v5 }
  0xd3   : > { %2267 = vrsqrt.f32 %v2839_v5  ;;  %1314 = vmatpush.bf16.msrb.mxu0 %v2053_v4 }
  0xd4   : > { %vm557_vm13 = vweird.f32 %v2857_v45 }
  0xd5   : > { %v447_v6 = vpop.xlane.xlu1 %446  ;;  %v443_v11 = vpop.xlane.xlu0 %442 }
  0xd6   : > { %v482_v10 = vmul.f32 %v2835_v46, %v447_v6  ;;  %v480_v14 = vmul.f32 %v2835_v46, %v443_v11 }
  0xd7   : > { %v451_v26 = vpop.xlane.xlu2 %450 }
  0xd8   : > { %v2843_v15 = vadd.f32 1e-06, %v482_v10  ;;  %v2266_v16 = vpop.eup %2265  ;;  %v496_v19 = vadd.f32 1e-06, %v480_v14  ;;  %v484_v40 = vmul.f32 %v2835_v46, %v451_v26 }
  0xd9   : > { %v512_v20 = vmul.f32 %v2266_v16, %v495_v63  ;;  %v2847_v35 = vpop.eup %2267  ;;  %vm518_vm1 = vweird.f32 %v2266_v16 }
  0xda   : > { %2269 = vrsqrt.f32 %v2843_v15  ;;  %v532_v44 = vmul.f32 %v2847_v35, %v2839_v5  ;;  %v2859_v49 = vadd.f32 1e-06, %v484_v40  ;;  %vm2863_vm3 = vmor %vm517_vm2, %vm518_vm1  ;;  %vm527_vm5 = vweird.f32 %v496_v19  ;;  %v2028_v5 = vld [vmem:[#allocation7 + $0x158] sm:$0xf]  ;;  %v2152_v40 = vld [vmem:[#allocation7 + $0x15c] sm:$0xf] }
  0xdb   : > { %2271 = vrsqrt.f32 %v496_v19  ;;  %v513_v21 = vmul.f32 %v2266_v16, %v512_v20  ;;  %vm547_vm7 = vweird.f32 %v2843_v15  ;;  %vm538_vm10 = vweird.f32 %v2847_v35 }
  0xdc   : > { %v533_v56 = vmul.f32 %v2847_v35, %v532_v44  ;;  %2273 = vrsqrt.f32 %v2857_v45  ;;  %vm2909_vm12 = vmor %vm537_vm9, %vm538_vm10  ;;  %v2030_v44 = vld [vmem:[#allocation7 + $0x178] sm:$0xf0]  ;;  %vm567_vm15 = vweird.f32 %v2859_v49 }
  0xdd   : > { %v514_v31 = vmul.f32 0.5, %v513_v21  ;;  %2275 = vrsqrt.f32 %v2859_v49  ;;  %v455_v9 = vpop.xlane.xlu1 %454  ;;  %v453_v14 = vpop.xlane.xlu0 %452  ;;  %v2033_v52 = vor.u32 %v2152_v40, %v2030_v44 }
  0xde   : > { %v534_v6 = vmul.f32 0.5, %v533_v56  ;;  %v486_v22 = vmul.f32 %v2835_v46, %v455_v9  ;;  %v485_v26 = vmul.f32 %v2835_v46, %v453_v14 }
  0xdf   : > { %v515_v39 = vsub.f32 1.5, %v514_v31  ;;  %1462 = vmatpush.bf16.msrb.mxu3 %v2033_v52  ;;  %v457_v61 = vpop.xlane.xlu2 %456 }
  0xe0   : > { %v2850_v37 = vpop.eup %2269  ;;  %v535_v23 = vsub.f32 1.5, %v534_v6  ;;  %v2904_v32 = vadd.f32 1e-06, %v486_v22 }
  0xe1   : > { %v2272_v41 = vpop.eup %2271  ;;  %v542_v42 = vmul.f32 %v2850_v37, %v2843_v15  ;;  %v516_v47 = vmul.f32 %v2266_v16, %v515_v39  ;;  %vm548_vm8 = vweird.f32 %v2850_v37  ;;  %v2156_v39 = vld [vmem:[#allocation7 + $0x174] sm:$0xf0] }
  0xe2   : > { %v522_v43 = vmul.f32 %v2272_v41, %v496_v19  ;;  %vm528_vm4 = vweird.f32 %v2272_v41  ;;  %v2878_v10 = vpop.eup %2273  ;;  %v2054_v19 = vld [vmem:[#allocation7 + $0x1b0] sm:$0xf0]  ;;  %vm2898_vm11 = vmor %vm547_vm7, %vm548_vm8  ;;  %v536_v36 = vmul.f32 %v2847_v35, %v535_v23  ;;  %v2029_v51 = vor.u32 %v2156_v39, %v2028_v5  ;;  %v2147_v5 = vld [vmem:[#allocation7 + $0x12c] sm:$0xf0] }
  0xe3   : > { %v543_v54 = vmul.f32 %v2850_v37, %v542_v42  ;;  %v520_v58 = vsel %vm2863_vm3, %v2266_v16, %v516_v47  ;;  %vm529_vm6 = vmor %vm527_vm5, %vm528_vm4  ;;  %v2159_v16 = vld [vmem:[#allocation7 + $0x194] sm:$0xf]  ;;  %v2881_v20 = vpop.eup %2275  ;;  %v2020_v47 = vld [vmem:[#allocation7 + $0x150] sm:$0xf]  ;;  %2277 = vrsqrt.f32 %v2904_v32  ;;  %vm558_vm14 = vweird.f32 %v2878_v10 }
  0xe4   : > { %v523_v48 = vmul.f32 %v2272_v41, %v522_v43  ;;  %v671_v2 = vmul.f32 %v520_v58, %v2736_v7  ;;  %v2057_v28 = vor.u32 %v2159_v16, %v2054_v19  ;;  %v562_v31 = vmul.f32 %v2881_v20, %v2859_v49  ;;  %1413 = vmatpush.bf16.msrb.mxu2 %v2029_v51  ;;  %vm2944_vm1 = vmor %vm557_vm13, %vm558_vm14  ;;  %v2143_v39 = vld [vmem:[#allocation7 + $0x114] sm:$0xf] }
  0xe5   : > { %v544_v63 = vmul.f32 0.5, %v543_v54  ;;  %v2914_v43 = vadd.f32 1e-06, %v485_v26  ;;  %v2151_v54 = vld [vmem:[#allocation7 + $0x154] sm:$0xf]  ;;  %v540_v56 = vsel %vm2909_vm12, %v2847_v35, %v536_v36  ;;  %v459_v35 = vpop.xlane.xlu0 %458  ;;  %vm568_vm0 = vweird.f32 %v2881_v20 }
  0xe6   : > { %v524_v55 = vmul.f32 0.5, %v523_v48  ;;  %v691_v21 = vmul.f32 %v2874_v1, %v671_v2  ;;  %1363 = vmatpush.bf16.msrb.mxu1 %v2057_v28  ;;  %v563_v50 = vmul.f32 %v2881_v20, %v562_v31  ;;  %v673_v60 = vmul.f32 %v540_v56, %v2731_v3  ;;  %vm2951_vm2 = vmor %vm567_vm15, %vm568_vm0  ;;  %v1998_v26 = vld [vmem:[#allocation7 + $0x138] sm:$0xf0]  ;;  %v1988_v28 = vld [vmem:[#allocation7 + $0x110] sm:$0xf] }
  0xe7   : > { %v545_v13 = vsub.f32 1.5, %v544_v63  ;;  %2279 = vrsqrt.f32 %v2914_v43  ;;  %v487_v3 = vmul.f32 %v2835_v46, %v457_v61  ;;  %v488_v6 = vmul.f32 %v2835_v46, %v459_v35  ;;  %v463_v52 = vpop.xlane.xlu2 %462  ;;  %v1964_v61 = vld [vmem:[#allocation7 + $0xd8] sm:$0xf] }
  0xe8   : > { %v525_v59 = vsub.f32 1.5, %v524_v55  ;;  %v2022_v55 = vld [vmem:[#allocation7 + $0x170] sm:$0xf0]  ;;  %v564_v33 = vmul.f32 0.5, %v563_v50  ;;  %v1989_v40 = vor.u32 %v2147_v5, %v1988_v28  ;;  %vm587_vm3 = vweird.f32 %v2904_v32 }
  0xe9   : > { %v546_v29 = vmul.f32 %v2850_v37, %v545_v13  ;;  %v2025_v58 = vor.u32 %v2151_v54, %v2022_v55  ;;  %v2928_v63 = vpop.eup %2277  ;;  %v2957_v16 = vadd.f32 1e-06, %v487_v3  ;;  %v2961_v19 = vadd.f32 1e-06, %v488_v6  ;;  %v461_v55 = vpop.xlane.xlu1 %460  ;;  %v1966_v3 = vld [vmem:[#allocation7 + $0xf8] sm:$0xf0] }
  0xea   : > { %v526_v0 = vmul.f32 %v2272_v41, %v525_v59  ;;  %v565_v2 = vsub.f32 1.5, %v564_v33  ;;  %v582_v9 = vmul.f32 %v2928_v63, %v2904_v32  ;;  %vm588_vm4 = vweird.f32 %v2928_v63  ;;  %v2127_v33 = vld [vmem:[#allocation7 + $0x94] sm:$0xf] }
  0xeb   : > { %v550_v48 = vsel %vm2898_vm11, %v2850_v37, %v546_v29  ;;  %v2021_v37 = vor.u32 %v2155_v53, %v2020_v47  ;;  %1364 = vmatpush.bf16.msrb.mxu1 %v2025_v58  ;;  %2281 = vrsqrt.f32 %v2957_v16  ;;  %vm577_vm5 = vweird.f32 %v2914_v43  ;;  %vm2990_vm7 = vmor %vm587_vm3, %vm588_vm4 }
  0xec   : > { %v530_v8 = vsel %vm529_vm6, %v2272_v41, %v526_v0  ;;  %v674_v57 = vmul.f32 %v550_v48, %v2747_v12  ;;  %v693_v12 = vmul.f32 %v2874_v1, %v673_v60  ;;  %v583_v22 = vmul.f32 %v2928_v63, %v582_v9  ;;  %v1990_v41 = vld [vmem:[#allocation7 + $0x130] sm:$0xf0] }
  0xed   : > { %v672_v11 = vmul.f32 %v530_v8, %v2756_v17  ;;  %v552_v17 = vmul.f32 %v2878_v10, %v2857_v45  ;;  %1315 = vmatpush.bf16.msrb.mxu0 %v2021_v37  ;;  %v2930_v4 = vpop.eup %2279  ;;  %v566_v45 = vmul.f32 %v2881_v20, %v565_v2  ;;  %2283 = vrsqrt.f32 %v2961_v19 }
  0xee   : > { %v694_v62 = vmul.f32 %v2874_v1, %v674_v57  ;;  %v572_v49 = vmul.f32 %v2930_v4, %v2914_v43  ;;  %v584_v47 = vmul.f32 0.5, %v583_v22  ;;  %vm578_vm6 = vweird.f32 %v2930_v4 }
  0xef   : > { %v692_v7 = vmul.f32 %v2874_v1, %v672_v11  ;;  %v553_v42 = vmul.f32 %v2878_v10, %v552_v17  ;;  %v2144_v17 = vld [vmem:[#allocation7 + $0x11c] sm:$0xf]  ;;  %v570_v31 = vsel %vm2951_vm2, %v2881_v20, %v566_v45  ;;  %v489_v37 = vmul.f32 %v2835_v46, %v461_v55  ;;  %vm2999_vm8 = vmor %vm577_vm5, %vm578_vm6  ;;  %v1956_v45 = vld [vmem:[#allocation7 + $0xd0] sm:$0xf] }
  0xf0   : > { %v2939_v8 = vpack.c.bf16 %v694_v62, %v693_v12  ;;  %v573_v15 = vmul.f32 %v2930_v4, %v572_v49  ;;  %v2001_v36 = vor.u32 %v2144_v17, %v1998_v26  ;;  %v585_v51 = vsub.f32 1.5, %v584_v47  ;;  %v2140_v62 = vld [vmem:[#allocation7 + $0xf4] sm:$0xf0]  ;;  %v2136_v12 = vld [vmem:[#allocation7 + $0xdc] sm:$0xf] }
  0xf1   : > { %v2888_v25 = vpack.c.bf16 %v692_v7, %v691_v21  ;;  %v554_v59 = vmul.f32 0.5, %v553_v42  ;;  %v1996_v21 = vld [vmem:[#allocation7 + $0x118] sm:$0xf]  ;;  %v1993_v42 = vor.u32 %v2143_v39, %v1990_v41  ;;  %1316 = vmatpush.bf16.msrb.mxu0 %v1989_v40  ;;  %v2977_v53 = vpop.eup %2281  ;;  %v1965_v2 = vor.u32 %v2140_v62, %v1964_v61  ;;  %v2139_v49 = vld [vmem:[#allocation7 + $0xec] sm:$0xf0]  ;;  %v467_v26 = vpop.xlane.xlu1 %466 }
  0xf2   : > { %v2148_v7 = vld [vmem:[#allocation7 + $0x134] sm:$0xf0]  ;;  %1463 = vmatpush.bf16.msrb.mxu3 %v2001_v36  ;;  %v574_v20 = vmul.f32 0.5, %v573_v15  ;;  %v586_v57 = vmul.f32 %v2928_v63, %v585_v51  ;;  %v1969_v13 = vor.u32 %v2136_v12, %v1966_v3  ;;  %v1957_v14 = vor.u32 %v2139_v49, %v1956_v45  ;;  %v1934_v55 = vld [vmem:[#allocation7 + $0xb8] sm:$0xf0]  ;;  %v469_v12 = vpop.xlane.xlu2 %468 }
  0xf3   : > { %1125 = vmatmul.bf16.vlgmr.msra.gmra.mxu0 %v2888_v25  ;;  %1174 = vmatmul.bf16.vlgmr.msra.gmra.mxu1 %v2888_v25  ;;  %v555_v0 = vsub.f32 1.5, %v554_v59  ;;  %v1997_v23 = vor.u32 %v2148_v7, %v1996_v21  ;;  %v2979_v56 = vpop.eup %2283  ;;  %v592_v59 = vmul.f32 %v2977_v53, %v2957_v16  ;;  %v1958_v21 = vld [vmem:[#allocation7 + $0xf0] sm:$0xf0]  ;;  %vm597_vm9 = vweird.f32 %v2957_v16 }
  0xf4   : > { %1223 = vmatmul.bf16.vlgmr.msra.gmra.mxu2 %v2888_v25  ;;  %1272 = vmatmul.bf16.vlgmr.msra.gmra.mxu3 %v2888_v25  ;;  %v575_v54 = vsub.f32 1.5, %v574_v20  ;;  %v602_v43 = vmul.f32 %v2979_v56, %v2961_v19  ;;  %v590_v35 = vsel %vm2990_vm7, %v2928_v63, %v586_v57  ;;  %v2135_v63 = vld [vmem:[#allocation7 + $0xd4] sm:$0xf]  ;;  %vm598_vm10 = vweird.f32 %v2977_v53 }
  0xf5   : > { %v556_v11 = vmul.f32 %v2878_v10, %v555_v0  ;;  %1414 = vmatpush.bf16.msrb.mxu2 %v1997_v23  ;;  %1365 = vmatpush.bf16.msrb.mxu1 %v1993_v42  ;;  %v3012_v0 = vadd.f32 1e-06, %v489_v37  ;;  %v593_v9 = vmul.f32 %v2977_v53, %v592_v59  ;;  %v678_v7 = vmul.f32 %v590_v35, %v2776_v27  ;;  %vm3040_vm13 = vmor %vm597_vm9, %vm598_vm10  ;;  %v2131_v59 = vld [vmem:[#allocation7 + $0xac] sm:$0xf0]  ;;  %v1926_v61 = vld [vmem:[#allocation7 + $0xb0] sm:$0xf0] }
  0xf6   : > { %v576_v32 = vmul.f32 %v2930_v4, %v575_v54  ;;  %1464 = vmatpush.bf16.msrb.mxu3 %v1969_v13  ;;  %1317 = vmatpush.bf16.msrb.mxu0 %v1957_v14  ;;  %v1961_v17 = vor.u32 %v2135_v63, %v1958_v21  ;;  %vm607_vm11 = vweird.f32 %v2961_v19  ;;  %vm608_vm12 = vweird.f32 %v2979_v56  ;;  %v2128_v54 = vld [vmem:[#allocation7 + $0x9c] sm:$0xf] }
  0xf7   : > { %v560_v29 = vsel %vm2944_vm1, %v2878_v10, %v556_v11  ;;  %v676_v10 = vmul.f32 %v570_v31, %v2770_v24  ;;  %v603_v11 = vmul.f32 %v2979_v56, %v602_v43  ;;  %v698_v28 = vmul.f32 %v2874_v1, %v678_v7  ;;  %v465_v31 = vpop.xlane.xlu0 %464  ;;  %vm3047_vm14 = vmor %vm607_vm11, %vm608_vm12 }
  0xf8   : > { %v675_v44 = vmul.f32 %v560_v29, %v2758_v18  ;;  %v490_v18 = vmul.f32 %v2835_v46, %v463_v52  ;;  %v580_v6 = vsel %vm2999_vm8, %v2930_v4, %v576_v32  ;;  %v594_v4 = vmul.f32 0.5, %v593_v9  ;;  %v1924_v32 = vld [vmem:[#allocation7 + $0x90] sm:$0xf] }
  0xf9   : > { %v696_v50 = vmul.f32 %v2874_v1, %v676_v10  ;;  %1415 = vmatpush.bf16.msrb.mxu2 %v1965_v2  ;;  %v677_v22 = vmul.f32 %v580_v6, %v2782_v30  ;;  %v604_v23 = vmul.f32 0.5, %v603_v11  ;;  %1366 = vmatpush.bf16.msrb.mxu1 %v1961_v17  ;;  %v492_v30 = vmul.f32 %v2835_v46, %v467_v26  ;;  %v2124_v17 = vld [vmem:[#allocation7 + $0x74] sm:$0xf0]  ;;  %v2120_v26 = vld [vmem:[#allocation7 + $0x5c] sm:$0xf] }
  0xfa   : > { %v695_v48 = vmul.f32 %v2874_v1, %v675_v44  ;;  %v3007_v60 = vadd.f32 1e-06, %v490_v18  ;;  %v595_v36 = vsub.f32 1.5, %v594_v4  ;;  %v491_v39 = vmul.f32 %v2835_v46, %v465_v31 }
  0xfb   : > { %v697_v29 = vmul.f32 %v2874_v1, %v677_v22  ;;  %v605_v5 = vsub.f32 1.5, %v604_v23  ;;  %v3053_v47 = vadd.f32 1e-06, %v492_v30  ;;  %v1937_v58 = vor.u32 %v2128_v54, %v1934_v55  ;;  %v1900_v23 = vld [vmem:[#allocation7 + $0x58] sm:$0xf] }
  0xfc   : > { %v2986_v24 = vpack.c.bf16 %v696_v50, %v695_v48  ;;  %2285 = vrsqrt.f32 %v3007_v60  ;;  %v596_v42 = vmul.f32 %v2977_v53, %v595_v36  ;;  %v3057_v20 = vadd.f32 1e-06, %v491_v39  ;;  %v1932_v48 = vld [vmem:[#allocation7 + $0x98] sm:$0xf]  ;;  %v1892_v30 = vld [vmem:[#allocation7 + $0x50] sm:$0xf] }
  0xfd   : > { %2287 = vrsqrt.f32 %v3012_v0  ;;  %v3035_v40 = vpack.c.bf16 %v698_v28, %v697_v29  ;;  %v606_v16 = vmul.f32 %v2979_v56, %v605_v5  ;;  %v2132_v50 = vld [vmem:[#allocation7 + $0xb4] sm:$0xf0]  ;;  %v1925_v43 = vor.u32 %v2131_v59, %v1924_v32  ;;  %1465 = vmatpush.bf16.msrb.mxu3 %v1937_v58  ;;  %v1902_v5 = vld [vmem:[#allocation7 + $0x78] sm:$0xf0]  ;;  %v2123_v39 = vld [vmem:[#allocation7 + $0x6c] sm:$0xf0] }
  0xfe   : > { %v1933_v52 = vor.u32 %v2132_v50, %v1932_v48  ;;  %v600_v18 = vsel %vm3040_vm13, %v2977_v53, %v596_v42  ;;  %2289 = vrsqrt.f32 %v3053_v47  ;;  %v1929_v62 = vor.u32 %v2127_v33, %v1926_v61  ;;  %v2298_v50 = vld [vmem:[%s2743_s27 + $0x50] sm:$0xff] }
  0xff   : > { %v610_v57 = vsel %vm3047_vm14, %v2979_v56, %v606_v16  ;;  %2291 = vrsqrt.f32 %v3057_v20  ;;  %v679_v53 = vmul.f32 %v600_v18, %v2790_v34  ;;  %1318 = vmatpush.bf16.msrb.mxu0 %v1925_v43  ;;  %v471_v3 = vpop.xlane.xlu0 %470  ;;  %vm627_vm15 = vweird.f32 %v3007_v60  ;;  %v2119_v16 = vld [vmem:[#allocation7 + $0x54] sm:$0xf] }
 0x100   : > { %1416 = vmatpush.bf16.msrb.mxu2 %v1933_v52  ;;  %v680_v35 = vmul.f32 %v610_v57, %v2798_v38  ;;  %1367 = vmatpush.bf16.msrb.mxu1 %v1929_v62  ;;  %v493_v34 = vmul.f32 %v2835_v46, %v469_v12  ;;  %v494_v38 = vmul.f32 %v2835_v46, %v471_v3  ;;  %vm617_vm1 = vweird.f32 %v3012_v0  ;;  %v1868_v62 = vld [vmem:[#allocation7 + $0x18] sm:$0xf]  ;;  %v1870_v3 = vld [vmem:[#allocation7 + $0x38] sm:$0xf0] }
 0x101   : > { %v699_v9 = vmul.f32 %v2874_v1, %v679_v53  ;;  %v1901_v36 = vor.u32 %v2124_v17, %v1900_v23  ;;  %v1905_v42 = vor.u32 %v2120_v26, %v1902_v5  ;;  %v1893_v44 = vor.u32 %v2123_v39, %v1892_v30  ;;  %v2116_v53 = vld [vmem:[#allocation7 + $0x34] sm:$0xf0] }
 0x102   : > { %v3025_v15 = vpop.eup %2285  ;;  %v700_v11 = vmul.f32 %v2874_v1, %v680_v35  ;;  %v3101_v22 = vadd.f32 1e-06, %v493_v34  ;;  %v3103_v4 = vadd.f32 1e-06, %v494_v38  ;;  %vm647_vm5 = vweird.f32 %v3053_v47  ;;  %v2112_v35 = vld [vmem:[#allocation7 + $0x1c] sm:$0xf] }
 0x103   : > { %1130 = vmatmul.bf16.gmra.mxu0 %v2939_v8  ;;  %1179 = vmatmul.bf16.gmra.mxu1 %v2939_v8  ;;  %v3027_v27 = vpop.eup %2287  ;;  %v622_v41 = vmul.f32 %v3025_v15, %v3007_v60  ;;  %vm628_vm0 = vweird.f32 %v3025_v15  ;;  %vm637_vm7 = vweird.f32 %v3057_v20  ;;  %v1869_v12 = vor.u32 %v2116_v53, %v1868_v62  ;;  %v2301_v30 = vld [vmem:[%s2743_s27 + $0x70] sm:$0xff] }
 0x104   : > { %1228 = vmatmul.bf16.gmra.mxu2 %v2939_v8  ;;  %1277 = vmatmul.bf16.gmra.mxu3 %v2939_v8  ;;  %v612_v19 = vmul.f32 %v3027_v27, %v3012_v0  ;;  %v3071_v6 = vpop.eup %2289  ;;  %vm618_vm2 = vweird.f32 %v3027_v27  ;;  %v3083_v14 = vpack.c.bf16 %v700_v11, %v699_v9  ;;  %vm3090_vm3 = vmor %vm627_vm15, %vm628_vm0  ;;  %2293 = vrsqrt.f32 %v3101_v22  ;;  %v1860_v9 = vld [vmem:[#allocation7 + $0x10] sm:$0xf] }
 0x105   : > { %v623_v51 = vmul.f32 %v3025_v15, %v622_v41  ;;  %v3075_v45 = vpop.eup %2291  ;;  %v642_v21 = vmul.f32 %v3071_v6, %v3053_v47  ;;  %vm3095_vm4 = vmor %vm617_vm1, %vm618_vm2  ;;  %1417 = vmatpush.bf16.msrb.mxu2 %v1901_v36  ;;  %1466 = vmatpush.bf16.msrb.mxu3 %v1905_v42  ;;  %2295 = vrsqrt.f32 %v3103_v4  ;;  %vm648_vm6 = vweird.f32 %v3071_v6  ;;  %v2115_v11 = vld [vmem:[#allocation7 + $0x2c] sm:$0xf0] }
 0x106   : > { %v613_v37 = vmul.f32 %v3027_v27, %v612_v19  ;;  %v632_v60 = vmul.f32 %v3075_v45, %v3057_v20  ;;  %v1894_v19 = vld [vmem:[#allocation7 + $0x70] sm:$0xf0]  ;;  %1319 = vmatpush.bf16.msrb.mxu0 %v1893_v44  ;;  %vm638_vm8 = vweird.f32 %v3075_v45  ;;  %vm3132_vm9 = vmor %vm647_vm5, %vm648_vm6  ;;  %v1873_v34 = vor.u32 %v2112_v35, %v1870_v3 }
 0x107   : > { %v624_v56 = vmul.f32 0.5, %v623_v51  ;;  %v643_v29 = vmul.f32 %v3071_v6, %v642_v21  ;;  %v1897_v10 = vor.u32 %v2119_v16, %v1894_v19  ;;  %vm3137_vm10 = vmor %vm637_vm7, %vm638_vm8  ;;  %v1861_v38 = vor.u32 %v2115_v11, %v1860_v9  ;;  %v1862_v21 = vld [vmem:[#allocation7 + $0x30] sm:$0xf0] }
 0x108   : > { %v614_v2 = vmul.f32 0.5, %v613_v37  ;;  %v633_v31 = vmul.f32 %v3075_v45, %v632_v60  ;;  %v2299_v60 = vld [vmem:[%s2743_s27 + $0x68] sm:$0xff]  ;;  %vm657_vm11 = vweird.f32 %v3101_v22  ;;  %vm667_vm13 = vweird.f32 %v3103_v4 }
 0x109   : > { %v625_v13 = vsub.f32 1.5, %v624_v56  ;;  %v644_v52 = vmul.f32 0.5, %v643_v29  ;;  %1368 = vmatpush.bf16.msrb.mxu1 %v1897_v10  ;;  %1418 = vmatpush.bf16.msrb.mxu2 %v1869_v12  ;;  %v3185_v10 = vld [vmem:[#allocation8] sm:$0xff] }
 0x10a   : > { %v615_v49 = vsub.f32 1.5, %v614_v2  ;;  %v634_v54 = vmul.f32 0.5, %v633_v31  ;;  %v3121_v37 = vpop.eup %2293  ;;  %1467 = vmatpush.bf16.msrb.mxu3 %v1873_v34  ;;  %1320 = vmatpush.bf16.msrb.mxu0 %v1861_v38 }
 0x10b   : > { %v626_v63 = vmul.f32 %v3025_v15, %v625_v13  ;;  %v645_v18 = vsub.f32 1.5, %v644_v52  ;;  %v3125_v58 = vpop.eup %2295  ;;  %v652_v61 = vmul.f32 %v3121_v37, %v3101_v22  ;;  %vm658_vm12 = vweird.f32 %v3121_v37 }
 0x10c   : > { %v616_v46 = vmul.f32 %v3027_v27, %v615_v49  ;;  %v635_v57 = vsub.f32 1.5, %v634_v54  ;;  %v662_v20 = vmul.f32 %v3125_v58, %v3103_v4  ;;  %vm668_vm14 = vweird.f32 %v3125_v58  ;;  %vm659_vm15 = vmor %vm657_vm11, %vm658_vm12 }
 0x10d   : > { %v630_v28 = vsel %vm3090_vm3, %v3025_v15, %v626_v63  ;;  %v2297_v15 = vld [vmem:[%s2743_s27 + $0x58] sm:$0xff]  ;;  %v646_v59 = vmul.f32 %v3071_v6, %v645_v18  ;;  %v653_v13 = vmul.f32 %v3121_v37, %v652_v61  ;;  %v2111_v63 = vld [vmem:[#allocation7 + $0x14] sm:$0xf]  ;;  %vm669_vm0 = vmor %vm667_vm13, %vm668_vm14 }
 0x10e   : > { %v620_v41 = vsel %vm3095_vm4, %v3027_v27, %v616_v46  ;;  %v682_v48 = vmul.f32 %v2297_v15, %v630_v28  ;;  %v636_v33 = vmul.f32 %v3075_v45, %v635_v57  ;;  %v663_v49 = vmul.f32 %v3125_v58, %v662_v20 }
 0x10f   : > { %v681_v51 = vmul.f32 %v2298_v50, %v620_v41  ;;  %v650_v56 = vsel %vm3132_vm9, %v3071_v6, %v646_v59  ;;  %v1865_v6 = vor.u32 %v2111_v63, %v1862_v21  ;;  %v654_v0 = vmul.f32 0.5, %v653_v13  ;;  %v2302_v41 = vld [vmem:[%s2743_s27 + $0x78] sm:$0xff] }
 0x110   : > { %v702_v27 = vmul.f32 %v2874_v1, %v682_v48  ;;  %v640_v2 = vsel %vm3137_vm10, %v3075_v45, %v636_v33  ;;  %v684_v7 = vmul.f32 %v2299_v60, %v650_v56  ;;  %v2300_v45 = vld [vmem:[%s2743_s27 + $0x60] sm:$0xff]  ;;  %v664_v23 = vmul.f32 0.5, %v663_v49 }
 0x111   : > { %v701_v55 = vmul.f32 %v2874_v1, %v681_v51  ;;  %v683_v46 = vmul.f32 %v2300_v45, %v640_v2  ;;  %1369 = vmatpush.bf16.msrb.mxu1 %v1865_v6  ;;  %v655_v28 = vsub.f32 1.5, %v654_v0  ;;  %v3188_v15 = vperm.slane %v3185_v10, 0 }
 0x112   : > { %v704_v17 = vmul.f32 %v2874_v1, %v684_v7  ;;  %v665_v29 = vsub.f32 1.5, %v664_v23  ;;  %v3191_v48 = vperm.slane %v3185_v10, 1 }
 0x113   : > { %1135 = vmatmul.bf16.gmra.mxu0 %v2986_v24  ;;  %1184 = vmatmul.bf16.gmra.mxu1 %v2986_v24  ;;  %v3129_v32 = vpack.c.bf16 %v702_v27, %v701_v55  ;;  %v703_v26 = vmul.f32 %v2874_v1, %v683_v46  ;;  %v656_v36 = vmul.f32 %v3121_v37, %v655_v28  ;;  %v3201_v27 = vperm.slane %v3185_v10, 2 }
 0x114   : > { %1233 = vmatmul.bf16.gmra.mxu2 %v2986_v24  ;;  %1282 = vmatmul.bf16.gmra.mxu3 %v2986_v24  ;;  %v666_v5 = vmul.f32 %v3125_v58, %v665_v29  ;;  %v3204_v55 = vperm.slane %v3185_v10, 3 }
 0x115   : > { %v3165_v31 = vpack.c.bf16 %v704_v17, %v703_v26  ;;  %v660_v22 = vsel %vm659_vm15, %v3121_v37, %v656_v36 }
 0x116   : > { %v670_v4 = vsel %vm669_vm0, %v3125_v58, %v666_v5  ;;  %v685_v39 = vmul.f32 %v2301_v30, %v660_v22 }
 0x117   : > { %v686_v42 = vmul.f32 %v2302_v41, %v670_v4 }
 0x118   : > { %v705_v44 = vmul.f32 %v2874_v1, %v685_v39 }
 0x119   : > { %v706_v16 = vmul.f32 %v2874_v1, %v686_v42 }
 0x11b   : > { %v3179_v19 = vpack.c.bf16 %v706_v16, %v705_v44 }
 0x123   : > { %1140 = vmatmul.bf16.gmra.mxu0 %v3035_v40  ;;  %1189 = vmatmul.bf16.gmra.mxu1 %v3035_v40 }
 0x124   : > { %1238 = vmatmul.bf16.gmra.mxu2 %v3035_v40  ;;  %1287 = vmatmul.bf16.gmra.mxu3 %v3035_v40 }
 0x133   : > { %1145 = vmatmul.bf16.gmra.mxu0 %v3083_v14  ;;  %1194 = vmatmul.bf16.gmra.mxu1 %v3083_v14 }
 0x134   : > { %1243 = vmatmul.bf16.gmra.mxu2 %v3083_v14  ;;  %1292 = vmatmul.bf16.gmra.mxu3 %v3083_v14 }
 0x143   : > { %1150 = vmatmul.bf16.gmra.mxu0 %v3129_v32  ;;  %1199 = vmatmul.bf16.gmra.mxu1 %v3129_v32 }
 0x144   : > { %1248 = vmatmul.bf16.gmra.mxu2 %v3129_v32  ;;  %1297 = vmatmul.bf16.gmra.mxu3 %v3129_v32 }
 0x153   : > { %1155 = vmatmul.bf16.gmra.mxu0 %v3165_v31  ;;  %1204 = vmatmul.bf16.gmra.mxu1 %v3165_v31 }
 0x154   : > { %1253 = vmatmul.bf16.gmra.mxu2 %v3165_v31  ;;  %1302 = vmatmul.bf16.gmra.mxu3 %v3165_v31 }
 0x163   : > { %1160 = vmatmul.bf16.gmra.mxu0 %v3179_v19  ;;  %1209 = vmatmul.bf16.gmra.mxu1 %v3179_v19 }
 0x164   : > { %1258 = vmatmul.bf16.gmra.mxu2 %v3179_v19  ;;  %1307 = vmatmul.bf16.gmra.mxu3 %v3179_v19 }
 0x170   : > { %v1126_v1 = vpop.f32.mrf.mxu0  ;;  %v1175_v50 = vpop.f32.mrf.mxu1 }
 0x171   : > { %v1127_v51 = vadd.f32 %v1126_v1, %v3188_v15  ;;  %v1176_v52 = vadd.f32 %v1175_v50, %v3191_v48 }
 0x173   : > { %v1509_v54 = vpack.c.bf16 %v1176_v52, %v1127_v51  ;;  %1321 = vmatmul.bf16.vlgmr.msrb.gmra.mxu0 %v2888_v25  ;;  %1370 = vmatmul.bf16.vlgmr.msrb.gmra.mxu1 %v2888_v25 }
 0x174   : > { %1419 = vmatmul.bf16.vlgmr.msrb.gmra.mxu2 %v2888_v25  ;;  %1468 = vmatmul.bf16.vlgmr.msrb.gmra.mxu3 %v2888_v25 }
 0x175   : > { %1573 = vst [vmem:[%s3206_s19] sm:$0xff] %v1509_v54 }
 0x177   : > { %v1224_v18 = vpop.f32.mrf.mxu2  ;;  %v1273_v57 = vpop.f32.mrf.mxu3 }
 0x178   : > { %v1225_v37 = vadd.f32 %v1224_v18, %v3201_v27  ;;  %v1274_v58 = vadd.f32 %v1273_v57, %v3204_v55  ;;  %v1128_v59 = vpop.f32.mrf.mxu0  ;;  %v1177_v25 = vpop.f32.mrf.mxu1 }
 0x179   : > { %v1129_v43 = vadd.f32 %v1128_v59, %v3188_v15  ;;  %v1178_v33 = vadd.f32 %v1177_v25, %v3191_v48 }
 0x17a   : > { %v1510_v47 = vpack.c.bf16 %v1274_v58, %v1225_v37 }
 0x17b   : > { %v1513_v61 = vpack.c.bf16 %v1178_v33, %v1129_v43 }
 0x17c   : > { %1574 = vst [vmem:[%s3206_s19 + $0x8] sm:$0xff] %v1510_v47 }
 0x17d   : > { %1577 = vst [vmem:[%s3206_s19 + $0x20] sm:$0xff] %v1513_v61 }
 0x17f   : > { %v1226_v20 = vpop.f32.mrf.mxu2  ;;  %v1275_v62 = vpop.f32.mrf.mxu3 }
 0x180   : > { %v1227_v53 = vadd.f32 %v1226_v20, %v3201_v27  ;;  %v1276_v35 = vadd.f32 %v1275_v62, %v3204_v55  ;;  %v1131_v56 = vpop.f32.mrf.mxu0  ;;  %v1180_v2 = vpop.f32.mrf.mxu1 }
 0x181   : > { %v1132_v12 = vadd.f32 %v1131_v56, %v3188_v15  ;;  %v1181_v3 = vadd.f32 %v1180_v2, %v3191_v48 }
 0x182   : > { %v1514_v9 = vpack.c.bf16 %v1276_v35, %v1227_v53 }
 0x183   : > { %v1517_v11 = vpack.c.bf16 %v1181_v3, %v1132_v12  ;;  %1326 = vmatmul.bf16.gmra.mxu0 %v2939_v8  ;;  %1375 = vmatmul.bf16.gmra.mxu1 %v2939_v8 }
 0x184   : > { %1578 = vst [vmem:[%s3206_s19 + $0x28] sm:$0xff] %v1514_v9  ;;  %1424 = vmatmul.bf16.gmra.mxu2 %v2939_v8  ;;  %1473 = vmatmul.bf16.gmra.mxu3 %v2939_v8 }
 0x185   : > { %1581 = vst [vmem:[%s3206_s19 + $0x40] sm:$0xff] %v1517_v11 }
 0x187   : > { %v1229_v13 = vpop.f32.mrf.mxu2  ;;  %v1278_v49 = vpop.f32.mrf.mxu3 }
 0x188   : > { %v1230_v34 = vadd.f32 %v1229_v13, %v3201_v27  ;;  %v1279_v38 = vadd.f32 %v1278_v49, %v3204_v55  ;;  %v1133_v63 = vpop.f32.mrf.mxu0  ;;  %v1182_v21 = vpop.f32.mrf.mxu1 }
 0x189   : > { %v1134_v6 = vadd.f32 %v1133_v63, %v3188_v15  ;;  %v1183_v60 = vadd.f32 %v1182_v21, %v3191_v48 }
 0x18a   : > { %v1518_v7 = vpack.c.bf16 %v1279_v38, %v1230_v34 }
 0x18b   : > { %v1521_v45 = vpack.c.bf16 %v1183_v60, %v1134_v6 }
 0x18c   : > { %1582 = vst [vmem:[%s3206_s19 + $0x48] sm:$0xff] %v1518_v7 }
 0x18d   : > { %1585 = vst [vmem:[%s3206_s19 + $0x60] sm:$0xff] %v1521_v45 }
 0x18f   : > { %v1231_v8 = vpop.f32.mrf.mxu2  ;;  %v1280_v46 = vpop.f32.mrf.mxu3 }
 0x190   : > { %v1232_v0 = vadd.f32 %v1231_v8, %v3201_v27  ;;  %v1281_v23 = vadd.f32 %v1280_v46, %v3204_v55  ;;  %v1136_v17 = vpop.f32.mrf.mxu0  ;;  %v1185_v26 = vpop.f32.mrf.mxu1 }
 0x191   : > { %v1137_v28 = vadd.f32 %v1136_v17, %v3188_v15  ;;  %v1186_v29 = vadd.f32 %v1185_v26, %v3191_v48 }
 0x192   : > { %v1522_v36 = vpack.c.bf16 %v1281_v23, %v1232_v0 }
 0x193   : > { %v1525_v5 = vpack.c.bf16 %v1186_v29, %v1137_v28  ;;  %1331 = vmatmul.bf16.gmra.mxu0 %v2986_v24  ;;  %1380 = vmatmul.bf16.gmra.mxu1 %v2986_v24 }
 0x194   : > { %1586 = vst [vmem:[%s3206_s19 + $0x68] sm:$0xff] %v1522_v36  ;;  %1429 = vmatmul.bf16.gmra.mxu2 %v2986_v24  ;;  %1478 = vmatmul.bf16.gmra.mxu3 %v2986_v24 }
 0x195   : > { %1589 = vst [vmem:[%s3206_s19 + $0x80] sm:$0xff] %v1525_v5 }
 0x197   : > { %v1234_v22 = vpop.f32.mrf.mxu2  ;;  %v1283_v4 = vpop.f32.mrf.mxu3 }
 0x198   : > { %v1235_v30 = vadd.f32 %v1234_v22, %v3201_v27  ;;  %v1284_v39 = vadd.f32 %v1283_v4, %v3204_v55  ;;  %v1138_v41 = vpop.f32.mrf.mxu0  ;;  %v1187_v42 = vpop.f32.mrf.mxu1 }
 0x199   : > { %v1139_v44 = vadd.f32 %v1138_v41, %v3188_v15  ;;  %v1188_v16 = vadd.f32 %v1187_v42, %v3191_v48 }
 0x19a   : > { %v1526_v1 = vpack.c.bf16 %v1284_v39, %v1235_v30 }
 0x19b   : > { %v1529_v50 = vpack.c.bf16 %v1188_v16, %v1139_v44 }
 0x19c   : > { %1590 = vst [vmem:[%s3206_s19 + $0x88] sm:$0xff] %v1526_v1 }
 0x19d   : > { %1593 = vst [vmem:[%s3206_s19 + $0xa0] sm:$0xff] %v1529_v50 }
 0x19f   : > { %v1236_v24 = vpop.f32.mrf.mxu2  ;;  %v1285_v51 = vpop.f32.mrf.mxu3 }
 0x1a0   : > { %v1237_v52 = vadd.f32 %v1236_v24, %v3201_v27  ;;  %v1286_v54 = vadd.f32 %v1285_v51, %v3204_v55  ;;  %v1141_v18 = vpop.f32.mrf.mxu0  ;;  %v1190_v57 = vpop.f32.mrf.mxu1 }
 0x1a1   : > { %v1142_v37 = vadd.f32 %v1141_v18, %v3188_v15  ;;  %v1191_v58 = vadd.f32 %v1190_v57, %v3191_v48 }
 0x1a2   : > { %v1530_v59 = vpack.c.bf16 %v1286_v54, %v1237_v52 }
 0x1a3   : > { %v1533_v25 = vpack.c.bf16 %v1191_v58, %v1142_v37  ;;  %1336 = vmatmul.bf16.gmra.mxu0 %v3035_v40  ;;  %1385 = vmatmul.bf16.gmra.mxu1 %v3035_v40 }
 0x1a4   : > { %1594 = vst [vmem:[%s3206_s19 + $0xa8] sm:$0xff] %v1530_v59  ;;  %1434 = vmatmul.bf16.gmra.mxu2 %v3035_v40  ;;  %1483 = vmatmul.bf16.gmra.mxu3 %v3035_v40 }
 0x1a5   : > { %1597 = vst [vmem:[%s3206_s19 + $0xc0] sm:$0xff] %v1533_v25 }
 0x1a7   : > { %v1239_v43 = vpop.f32.mrf.mxu2  ;;  %v1288_v33 = vpop.f32.mrf.mxu3 }
 0x1a8   : > { %v1240_v47 = vadd.f32 %v1239_v43, %v3201_v27  ;;  %v1289_v61 = vadd.f32 %v1288_v33, %v3204_v55  ;;  %v1143_v20 = vpop.f32.mrf.mxu0  ;;  %v1192_v62 = vpop.f32.mrf.mxu1 }
 0x1a9   : > { %v1144_v53 = vadd.f32 %v1143_v20, %v3188_v15  ;;  %v1193_v35 = vadd.f32 %v1192_v62, %v3191_v48 }
 0x1aa   : > { %v1534_v56 = vpack.c.bf16 %v1289_v61, %v1240_v47 }
 0x1ab   : > { %v1537_v2 = vpack.c.bf16 %v1193_v35, %v1144_v53 }
 0x1ac   : > { %1598 = vst [vmem:[%s3206_s19 + $0xc8] sm:$0xff] %v1534_v56 }
 0x1ad   : > { %1601 = vst [vmem:[%s3206_s19 + $0xe0] sm:$0xff] %v1537_v2 }
 0x1af   : > { %v1241_v40 = vpop.f32.mrf.mxu2  ;;  %v1290_v12 = vpop.f32.mrf.mxu3 }
 0x1b0   : > { %v1242_v3 = vadd.f32 %v1241_v40, %v3201_v27  ;;  %v1291_v9 = vadd.f32 %v1290_v12, %v3204_v55  ;;  %v1146_v11 = vpop.f32.mrf.mxu0  ;;  %v1195_v13 = vpop.f32.mrf.mxu1 }
 0x1b1   : > { %v1147_v49 = vadd.f32 %v1146_v11, %v3188_v15  ;;  %v1196_v34 = vadd.f32 %v1195_v13, %v3191_v48 }
 0x1b2   : > { %v1538_v38 = vpack.c.bf16 %v1291_v9, %v1242_v3 }
 0x1b3   : > { %v1541_v63 = vpack.c.bf16 %v1196_v34, %v1147_v49  ;;  %1341 = vmatmul.bf16.gmra.mxu0 %v3083_v14  ;;  %1390 = vmatmul.bf16.gmra.mxu1 %v3083_v14 }
 0x1b4   : > { %1602 = vst [vmem:[%s3206_s19 + $0xe8] sm:$0xff] %v1538_v38  ;;  %1439 = vmatmul.bf16.gmra.mxu2 %v3083_v14  ;;  %1488 = vmatmul.bf16.gmra.mxu3 %v3083_v14 }
 0x1b5   : > { %1605 = vst [vmem:[%s3206_s19 + $0x100] sm:$0xff] %v1541_v63 }
 0x1b7   : > { %v1244_v21 = vpop.f32.mrf.mxu2  ;;  %v1293_v6 = vpop.f32.mrf.mxu3 }
 0x1b8   : > { %v1245_v60 = vadd.f32 %v1244_v21, %v3201_v27  ;;  %v1294_v7 = vadd.f32 %v1293_v6, %v3204_v55  ;;  %v1148_v45 = vpop.f32.mrf.mxu0  ;;  %v1197_v8 = vpop.f32.mrf.mxu1 }
 0x1b9   : > { %v1149_v46 = vadd.f32 %v1148_v45, %v3188_v15  ;;  %v1198_v0 = vadd.f32 %v1197_v8, %v3191_v48 }
 0x1ba   : > { %v1542_v23 = vpack.c.bf16 %v1294_v7, %v1245_v60 }
 0x1bb   : > { %v1545_v17 = vpack.c.bf16 %v1198_v0, %v1149_v46 }
 0x1bc   : > { %1606 = vst [vmem:[%s3206_s19 + $0x108] sm:$0xff] %v1542_v23 }
 0x1bd   : > { %1609 = vst [vmem:[%s3206_s19 + $0x120] sm:$0xff] %v1545_v17 }
 0x1bf   : > { %v1246_v14 = vpop.f32.mrf.mxu2  ;;  %v1295_v26 = vpop.f32.mrf.mxu3 }
 0x1c0   : > { %v1247_v28 = vadd.f32 %v1246_v14, %v3201_v27  ;;  %v1296_v29 = vadd.f32 %v1295_v26, %v3204_v55  ;;  %v1151_v36 = vpop.f32.mrf.mxu0  ;;  %v1200_v5 = vpop.f32.mrf.mxu1 }
 0x1c1   : > { %v1152_v22 = vadd.f32 %v1151_v36, %v3188_v15  ;;  %v1201_v4 = vadd.f32 %v1200_v5, %v3191_v48 }
 0x1c2   : > { %v1546_v30 = vpack.c.bf16 %v1296_v29, %v1247_v28  ;;  %v3331_v28 = vperm.slane %v3185_v10, 5 }
 0x1c3   : > { %v1549_v39 = vpack.c.bf16 %v1201_v4, %v1152_v22  ;;  %1346 = vmatmul.bf16.gmra.mxu0 %v3129_v32  ;;  %1395 = vmatmul.bf16.gmra.mxu1 %v3129_v32 }
 0x1c4   : > { %1610 = vst [vmem:[%s3206_s19 + $0x128] sm:$0xff] %v1546_v30  ;;  %1444 = vmatmul.bf16.gmra.mxu2 %v3129_v32  ;;  %1493 = vmatmul.bf16.gmra.mxu3 %v3129_v32 }
 0x1c5   : > { %1613 = vst [vmem:[%s3206_s19 + $0x140] sm:$0xff] %v1549_v39 }
 0x1c7   : > { %v1249_v41 = vpop.f32.mrf.mxu2  ;;  %v1298_v42 = vpop.f32.mrf.mxu3 }
 0x1c8   : > { %v1250_v44 = vadd.f32 %v1249_v41, %v3201_v27  ;;  %v1299_v16 = vadd.f32 %v1298_v42, %v3204_v55  ;;  %v1153_v1 = vpop.f32.mrf.mxu0  ;;  %v1202_v50 = vpop.f32.mrf.mxu1  ;;  %v3340_v42 = vperm.slane %v3185_v10, 6 }
 0x1c9   : > { %v1154_v24 = vadd.f32 %v1153_v1, %v3188_v15  ;;  %v1203_v51 = vadd.f32 %v1202_v50, %v3191_v48 }
 0x1ca   : > { %v1550_v52 = vpack.c.bf16 %v1299_v16, %v1250_v44  ;;  %v3343_v44 = vperm.slane %v3185_v10, 7 }
 0x1cb   : > { %v1553_v54 = vpack.c.bf16 %v1203_v51, %v1154_v24 }
 0x1cc   : > { %1614 = vst [vmem:[%s3206_s19 + $0x148] sm:$0xff] %v1550_v52 }
 0x1cd   : > { %1617 = vst [vmem:[%s3206_s19 + $0x160] sm:$0xff] %v1553_v54 }
 0x1cf   : > { %v1251_v32 = vpop.f32.mrf.mxu2  ;;  %v1300_v18 = vpop.f32.mrf.mxu3 }
 0x1d0   : > { %v1252_v57 = vadd.f32 %v1251_v32, %v3201_v27  ;;  %v1301_v37 = vadd.f32 %v1300_v18, %v3204_v55  ;;  %v1156_v58 = vpop.f32.mrf.mxu0  ;;  %v1205_v59 = vpop.f32.mrf.mxu1 }
 0x1d1   : > { %v1157_v25 = vadd.f32 %v1156_v58, %v3188_v15  ;;  %v1206_v43 = vadd.f32 %v1205_v59, %v3191_v48 }
 0x1d2   : > { %v1554_v33 = vpack.c.bf16 %v1301_v37, %v1252_v57 }
 0x1d3   : > { %v1557_v47 = vpack.c.bf16 %v1206_v43, %v1157_v25  ;;  %1351 = vmatmul.bf16.gmra.mxu0 %v3165_v31  ;;  %1400 = vmatmul.bf16.gmra.mxu1 %v3165_v31 }
 0x1d4   : > { %1618 = vst [vmem:[%s3206_s19 + $0x168] sm:$0xff] %v1554_v33  ;;  %1449 = vmatmul.bf16.gmra.mxu2 %v3165_v31  ;;  %1498 = vmatmul.bf16.gmra.mxu3 %v3165_v31 }
 0x1d5   : > { %1621 = vst [vmem:[%s3206_s19 + $0x180] sm:$0xff] %v1557_v47 }
 0x1d7   : > { %v1254_v61 = vpop.f32.mrf.mxu2  ;;  %v1303_v20 = vpop.f32.mrf.mxu3 }
 0x1d8   : > { %v1255_v62 = vadd.f32 %v1254_v61, %v3201_v27  ;;  %v1304_v53 = vadd.f32 %v1303_v20, %v3204_v55  ;;  %v1158_v35 = vpop.f32.mrf.mxu0  ;;  %v1207_v56 = vpop.f32.mrf.mxu1 }
 0x1d9   : > { %v1159_v2 = vadd.f32 %v1158_v35, %v3188_v15  ;;  %v1208_v40 = vadd.f32 %v1207_v56, %v3191_v48 }
 0x1da   : > { %v1558_v12 = vpack.c.bf16 %v1304_v53, %v1255_v62 }
 0x1db   : > { %v1561_v3 = vpack.c.bf16 %v1208_v40, %v1159_v2 }
 0x1dc   : > { %1622 = vst [vmem:[%s3206_s19 + $0x188] sm:$0xff] %v1558_v12 }
 0x1dd   : > { %1625 = vst [vmem:[%s3206_s19 + $0x1a0] sm:$0xff] %v1561_v3 }
 0x1df   : > { %v1256_v31 = vpop.f32.mrf.mxu2  ;;  %v1305_v9 = vpop.f32.mrf.mxu3 }
 0x1e0   : > { %v1257_v11 = vadd.f32 %v1256_v31, %v3201_v27  ;;  %v1306_v13 = vadd.f32 %v1305_v9, %v3204_v55  ;;  %v1161_v49 = vpop.f32.mrf.mxu0  ;;  %v1210_v34 = vpop.f32.mrf.mxu1 }
 0x1e1   : > { %v1162_v38 = vadd.f32 %v1161_v49, %v3188_v15  ;;  %v1211_v63 = vadd.f32 %v1210_v34, %v3191_v48 }
 0x1e2   : > { %v1562_v21 = vpack.c.bf16 %v1306_v13, %v1257_v11 }
 0x1e3   : > { %v1565_v6 = vpack.c.bf16 %v1211_v63, %v1162_v38  ;;  %1356 = vmatmul.bf16.gmra.mxu0 %v3179_v19  ;;  %1405 = vmatmul.bf16.gmra.mxu1 %v3179_v19 }
 0x1e4   : > { %1626 = vst [vmem:[%s3206_s19 + $0x1a8] sm:$0xff] %v1562_v21  ;;  %1454 = vmatmul.bf16.gmra.mxu2 %v3179_v19  ;;  %1503 = vmatmul.bf16.gmra.mxu3 %v3179_v19  ;;  %v3328_v19 = vperm.slane %v3185_v10, 4 }
 0x1e5   : > { %1629 = vst [vmem:[%s3206_s19 + $0x1c0] sm:$0xff] %v1565_v6 }
 0x1e7   : > { %v1259_v60 = vpop.f32.mrf.mxu2  ;;  %v1308_v7 = vpop.f32.mrf.mxu3 }
 0x1e8   : > { %v1260_v45 = vadd.f32 %v1259_v60, %v3201_v27  ;;  %v1309_v8 = vadd.f32 %v1308_v7, %v3204_v55  ;;  %v1163_v46 = vpop.f32.mrf.mxu0  ;;  %v1212_v0 = vpop.f32.mrf.mxu1 }
 0x1e9   : > { %v1164_v23 = vadd.f32 %v1163_v46, %v3188_v15  ;;  %v1213_v17 = vadd.f32 %v1212_v0, %v3191_v48 }
 0x1ea   : > { %v1566_v14 = vpack.c.bf16 %v1309_v8, %v1260_v45 }
 0x1eb   : > { %v1569_v26 = vpack.c.bf16 %v1213_v17, %v1164_v23 }
 0x1ec   : > { %1630 = vst [vmem:[%s3206_s19 + $0x1c8] sm:$0xff] %v1566_v14 }
 0x1ed   : > { %1633 = vst [vmem:[%s3206_s19 + $0x1e0] sm:$0xff] %v1569_v26 }
 0x1ef   : > { %v1261_v29 = vpop.f32.mrf.mxu2  ;;  %v1310_v36 = vpop.f32.mrf.mxu3 }
 0x1f0   : > { %v1262_v5 = vadd.f32 %v1261_v29, %v3201_v27  ;;  %v1311_v15 = vadd.f32 %v1310_v36, %v3204_v55  ;;  %v1322_v48 = vpop.f32.mrf.mxu0  ;;  %v1371_v22 = vpop.f32.mrf.mxu1 }
 0x1f1   : > { %v1323_v4 = vadd.f32 %v1322_v48, %v3328_v19  ;;  %v1372_v30 = vadd.f32 %v1371_v22, %v3331_v28 }
 0x1f2   : > { %v1570_v39 = vpack.c.bf16 %v1311_v15, %v1262_v5 }
 0x1f3   : > { %v1511_v41 = vpack.c.bf16 %v1372_v30, %v1323_v4 }
 0x1f4   : > { %1634 = vst [vmem:[%s3206_s19 + $0x1e8] sm:$0xff] %v1570_v39 }
 0x1f5   : > { %1575 = vst [vmem:[%s3206_s19 + $0x10] sm:$0xff] %v1511_v41 }
 0x1f7   : > { %v1420_v27 = vpop.f32.mrf.mxu2  ;;  %v1469_v55 = vpop.f32.mrf.mxu3 }
 0x1f8   : > { %v1421_v16 = vadd.f32 %v1420_v27, %v3340_v42  ;;  %v1470_v1 = vadd.f32 %v1469_v55, %v3343_v44  ;;  %v1324_v50 = vpop.f32.mrf.mxu0  ;;  %v1373_v24 = vpop.f32.mrf.mxu1 }
 0x1f9   : > { %v1325_v10 = vadd.f32 %v1324_v50, %v3328_v19  ;;  %v1374_v51 = vadd.f32 %v1373_v24, %v3331_v28 }
 0x1fa   : > { %v1512_v52 = vpack.c.bf16 %v1470_v1, %v1421_v16 }
 0x1fb   : > { %2450 = shalt.err (!%p2447_p9)
}
 0x1fc   : > { %s2542_s27 = smov 128   ;;  %s2543_s8 = smov 8   ;;  %v1515_v54 = vpack.c.bf16 %v1374_v51, %v1325_v10  ;;  %1576 = vst [vmem:[%s3206_s19 + $0x18] sm:$0xff] %v1512_v52 }
 0x1fd   : > { %2189 = dma.vmem_to_hbm [thread:$0]  (%p2647_p3), %s1674_s15, 2048, %s1676_s17, %s1643_s4, %s2542_s27, %s2542_s27, %s2543_s8  }
 0x1fe   : > { %1579 = vst [vmem:[%s3206_s19 + $0x30] sm:$0xff] %v1515_v54  ;;  %s2174_s16 = sshll.u32 %s2602_s25, 9  ;;  %s1656_s13 = sshll.u32 %s3206_s19, 4  ;;  %s1657_s13 = int_to_ptr.vmem [resolvable:$true] %s1656_s13 }
 0x1ff   : > { %v1422_v32 = vpop.f32.mrf.mxu2  ;;  %v1471_v18 = vpop.f32.mrf.mxu3  ;;  %s1655_s12 = scalar_lea.hbm %s3493_s5, %s2174_s16  ;;  %s1638_s25 = scalar_lea.sflag [#allocation4], %s2703_s29 }
 0x200   : > { %v1423_v57 = vadd.f32 %v1422_v32, %v3340_v42  ;;  %v1472_v37 = vadd.f32 %v1471_v18, %v3343_v44  ;;  %v1327_v58 = vpop.f32.mrf.mxu0  ;;  %v1376_v59 = vpop.f32.mrf.mxu1  ;;  %s1658_s14 = sshll.u32 %s1655_s12, 4  ;;  %s2471_s10 = scalar_lea.hbm %s3493_s5, 1024  ;;  %s1659_s14 = int_to_ptr.hbm [resolvable:$true] %s1658_s14 }
 0x201   : > { %v1328_v25 = vadd.f32 %v1327_v58, %v3328_v19  ;;  %v1377_v43 = vadd.f32 %v1376_v59, %v3331_v28  ;;  %s2465_s15 = sshra.s32 %s1659_s14, 4  ;;  %s2466_s15 = int_to_ptr.hbm [resolvable:$true] %s2465_s15 }
 0x202   : > { %v1516_v33 = vpack.c.bf16 %v1472_v37, %v1423_v57  ;;  %s2467_s17 = scalar_lea.hbm %s2466_s15, 512  ;;  %p2472_p5 = scmp.lt.s32.totalorder %s2466_s15, %s3493_s5 }
 0x203   : > { %v1519_v47 = vpack.c.bf16 %v1377_v43, %v1328_v25  ;;  %p2468_p12 = scmp.ne.s32.totalorder %s2466_s15, %s2467_s17  ;;  %p2473_p7 = scmp.lt.s32.totalorder %s2471_s10, %s2467_s17 }
 0x204   : > { %1580 = vst [vmem:[%s3206_s19 + $0x38] sm:$0xff] %v1516_v33 }
 0x205   : > { %1583 = vst [vmem:[%s3206_s19 + $0x50] sm:$0xff] %v1519_v47  ;;  %p2469_p13 = pnand %p2468_p12, %p2647_p3  ;;  %p2474_p1 = por %p2473_p7, %p2472_p5 }
 0x207   : > { %v1425_v61 = vpop.f32.mrf.mxu2  ;;  %v1474_v20 = vpop.f32.mrf.mxu3  ;;  %p2470_p0 = pneg %p2469_p13 }
 0x208   : > { %v1426_v62 = vadd.f32 %v1425_v61, %v3340_v42  ;;  %v1475_v53 = vadd.f32 %v1474_v20, %v3343_v44  ;;  %v1329_v35 = vpop.f32.mrf.mxu0  ;;  %v1378_v56 = vpop.f32.mrf.mxu1 }
 0x209   : > { %v1330_v2 = vadd.f32 %v1329_v35, %v3328_v19  ;;  %v1379_v40 = vadd.f32 %v1378_v56, %v3331_v28  ;;  %p2475_p4 = pnand %p2474_p1, %p2470_p0 }
 0x20a   : > { %v1520_v12 = vpack.c.bf16 %v1475_v53, %v1426_v62 }
 0x20b   : > { %v1523_v3 = vpack.c.bf16 %v1379_v40, %v1330_v2 }
 0x20c   : > { %1584 = vst [vmem:[%s3206_s19 + $0x58] sm:$0xff] %v1520_v12 }
 0x20d   : > { %1587 = vst [vmem:[%s3206_s19 + $0x70] sm:$0xff] %v1523_v3 }
 0x20f   : > { %v1427_v31 = vpop.f32.mrf.mxu2  ;;  %v1476_v9 = vpop.f32.mrf.mxu3 }
 0x210   : > { %v1428_v11 = vadd.f32 %v1427_v31, %v3340_v42  ;;  %v1477_v13 = vadd.f32 %v1476_v9, %v3343_v44  ;;  %v1332_v49 = vpop.f32.mrf.mxu0  ;;  %v1381_v34 = vpop.f32.mrf.mxu1 }
 0x211   : > { %v1333_v38 = vadd.f32 %v1332_v49, %v3328_v19  ;;  %v1382_v63 = vadd.f32 %v1381_v34, %v3331_v28 }
 0x212   : > { %v1524_v21 = vpack.c.bf16 %v1477_v13, %v1428_v11 }
 0x213   : > { %v1527_v6 = vpack.c.bf16 %v1382_v63, %v1333_v38 }
 0x214   : > { %1588 = vst [vmem:[%s3206_s19 + $0x78] sm:$0xff] %v1524_v21 }
 0x215   : > { %1591 = vst [vmem:[%s3206_s19 + $0x90] sm:$0xff] %v1527_v6 }
 0x217   : > { %v1430_v60 = vpop.f32.mrf.mxu2  ;;  %v1479_v7 = vpop.f32.mrf.mxu3 }
 0x218   : > { %v1431_v45 = vadd.f32 %v1430_v60, %v3340_v42  ;;  %v1480_v8 = vadd.f32 %v1479_v7, %v3343_v44  ;;  %v1334_v46 = vpop.f32.mrf.mxu0  ;;  %v1383_v0 = vpop.f32.mrf.mxu1 }
 0x219   : > { %v1335_v23 = vadd.f32 %v1334_v46, %v3328_v19  ;;  %v1384_v17 = vadd.f32 %v1383_v0, %v3331_v28 }
 0x21a   : > { %v1528_v14 = vpack.c.bf16 %v1480_v8, %v1431_v45 }
 0x21b   : > { %v1531_v26 = vpack.c.bf16 %v1384_v17, %v1335_v23 }
 0x21c   : > { %1592 = vst [vmem:[%s3206_s19 + $0x98] sm:$0xff] %v1528_v14 }
 0x21d   : > { %1595 = vst [vmem:[%s3206_s19 + $0xb0] sm:$0xff] %v1531_v26 }
 0x21f   : > { %v1432_v29 = vpop.f32.mrf.mxu2  ;;  %v1481_v36 = vpop.f32.mrf.mxu3 }
 0x220   : > { %v1433_v5 = vadd.f32 %v1432_v29, %v3340_v42  ;;  %v1482_v15 = vadd.f32 %v1481_v36, %v3343_v44  ;;  %v1337_v48 = vpop.f32.mrf.mxu0  ;;  %v1386_v22 = vpop.f32.mrf.mxu1 }
 0x221   : > { %v1338_v4 = vadd.f32 %v1337_v48, %v3328_v19  ;;  %v1387_v30 = vadd.f32 %v1386_v22, %v3331_v28 }
 0x222   : > { %v1532_v39 = vpack.c.bf16 %v1482_v15, %v1433_v5 }
 0x223   : > { %v1535_v41 = vpack.c.bf16 %v1387_v30, %v1338_v4 }
 0x224   : > { %1596 = vst [vmem:[%s3206_s19 + $0xb8] sm:$0xff] %v1532_v39 }
 0x225   : > { %1599 = vst [vmem:[%s3206_s19 + $0xd0] sm:$0xff] %v1535_v41 }
 0x227   : > { %v1435_v27 = vpop.f32.mrf.mxu2  ;;  %v1484_v55 = vpop.f32.mrf.mxu3 }
 0x228   : > { %v1436_v16 = vadd.f32 %v1435_v27, %v3340_v42  ;;  %v1485_v1 = vadd.f32 %v1484_v55, %v3343_v44  ;;  %v1339_v50 = vpop.f32.mrf.mxu0  ;;  %v1388_v24 = vpop.f32.mrf.mxu1 }
 0x229   : > { %v1340_v10 = vadd.f32 %v1339_v50, %v3328_v19  ;;  %v1389_v51 = vadd.f32 %v1388_v24, %v3331_v28 }
 0x22a   : > { %v1536_v52 = vpack.c.bf16 %v1485_v1, %v1436_v16 }
 0x22b   : > { %v1539_v54 = vpack.c.bf16 %v1389_v51, %v1340_v10 }
 0x22c   : > { %1600 = vst [vmem:[%s3206_s19 + $0xd8] sm:$0xff] %v1536_v52 }
 0x22d   : > { %1603 = vst [vmem:[%s3206_s19 + $0xf0] sm:$0xff] %v1539_v54 }
 0x22f   : > { %v1437_v32 = vpop.f32.mrf.mxu2  ;;  %v1486_v18 = vpop.f32.mrf.mxu3 }
 0x230   : > { %v1438_v57 = vadd.f32 %v1437_v32, %v3340_v42  ;;  %v1487_v37 = vadd.f32 %v1486_v18, %v3343_v44  ;;  %v1342_v58 = vpop.f32.mrf.mxu0  ;;  %v1391_v59 = vpop.f32.mrf.mxu1 }
 0x231   : > { %v1343_v25 = vadd.f32 %v1342_v58, %v3328_v19  ;;  %v1392_v43 = vadd.f32 %v1391_v59, %v3331_v28 }
 0x232   : > { %v1540_v33 = vpack.c.bf16 %v1487_v37, %v1438_v57 }
 0x233   : > { %v1543_v47 = vpack.c.bf16 %v1392_v43, %v1343_v25 }
 0x234   : > { %1604 = vst [vmem:[%s3206_s19 + $0xf8] sm:$0xff] %v1540_v33 }
 0x235   : > { %1607 = vst [vmem:[%s3206_s19 + $0x110] sm:$0xff] %v1543_v47 }
 0x237   : > { %v1440_v61 = vpop.f32.mrf.mxu2  ;;  %v1489_v20 = vpop.f32.mrf.mxu3 }
 0x238   : > { %v1441_v62 = vadd.f32 %v1440_v61, %v3340_v42  ;;  %v1490_v53 = vadd.f32 %v1489_v20, %v3343_v44  ;;  %v1344_v35 = vpop.f32.mrf.mxu0  ;;  %v1393_v56 = vpop.f32.mrf.mxu1 }
 0x239   : > { %v1345_v2 = vadd.f32 %v1344_v35, %v3328_v19  ;;  %v1394_v40 = vadd.f32 %v1393_v56, %v3331_v28 }
 0x23a   : > { %v1544_v12 = vpack.c.bf16 %v1490_v53, %v1441_v62 }
 0x23b   : > { %v1547_v3 = vpack.c.bf16 %v1394_v40, %v1345_v2 }
 0x23c   : > { %1608 = vst [vmem:[%s3206_s19 + $0x118] sm:$0xff] %v1544_v12 }
 0x23d   : > { %1611 = vst [vmem:[%s3206_s19 + $0x130] sm:$0xff] %v1547_v3 }
 0x23f   : > { %v1442_v31 = vpop.f32.mrf.mxu2  ;;  %v1491_v9 = vpop.f32.mrf.mxu3 }
 0x240   : > { %v1443_v11 = vadd.f32 %v1442_v31, %v3340_v42  ;;  %v1492_v13 = vadd.f32 %v1491_v9, %v3343_v44  ;;  %v1347_v49 = vpop.f32.mrf.mxu0  ;;  %v1396_v34 = vpop.f32.mrf.mxu1 }
 0x241   : > { %v1348_v38 = vadd.f32 %v1347_v49, %v3328_v19  ;;  %v1397_v63 = vadd.f32 %v1396_v34, %v3331_v28 }
 0x242   : > { %v1548_v21 = vpack.c.bf16 %v1492_v13, %v1443_v11 }
 0x243   : > { %v1551_v6 = vpack.c.bf16 %v1397_v63, %v1348_v38 }
 0x244   : > { %1612 = vst [vmem:[%s3206_s19 + $0x138] sm:$0xff] %v1548_v21 }
 0x245   : > { %1615 = vst [vmem:[%s3206_s19 + $0x150] sm:$0xff] %v1551_v6 }
 0x247   : > { %v1445_v60 = vpop.f32.mrf.mxu2  ;;  %v1494_v7 = vpop.f32.mrf.mxu3 }
 0x248   : > { %v1446_v45 = vadd.f32 %v1445_v60, %v3340_v42  ;;  %v1495_v8 = vadd.f32 %v1494_v7, %v3343_v44  ;;  %v1349_v46 = vpop.f32.mrf.mxu0  ;;  %v1398_v0 = vpop.f32.mrf.mxu1 }
 0x249   : > { %v1350_v23 = vadd.f32 %v1349_v46, %v3328_v19  ;;  %v1399_v17 = vadd.f32 %v1398_v0, %v3331_v28 }
 0x24a   : > { %v1552_v14 = vpack.c.bf16 %v1495_v8, %v1446_v45 }
 0x24b   : > { %v1555_v26 = vpack.c.bf16 %v1399_v17, %v1350_v23 }
 0x24c   : > { %1616 = vst [vmem:[%s3206_s19 + $0x158] sm:$0xff] %v1552_v14 }
 0x24d   : > { %1619 = vst [vmem:[%s3206_s19 + $0x170] sm:$0xff] %v1555_v26 }
 0x24f   : > { %v1447_v29 = vpop.f32.mrf.mxu2  ;;  %v1496_v36 = vpop.f32.mrf.mxu3 }
 0x250   : > { %v1448_v5 = vadd.f32 %v1447_v29, %v3340_v42  ;;  %v1497_v15 = vadd.f32 %v1496_v36, %v3343_v44  ;;  %v1352_v48 = vpop.f32.mrf.mxu0  ;;  %v1401_v22 = vpop.f32.mrf.mxu1 }
 0x251   : > { %v1353_v4 = vadd.f32 %v1352_v48, %v3328_v19  ;;  %v1402_v30 = vadd.f32 %v1401_v22, %v3331_v28 }
 0x252   : > { %v1556_v39 = vpack.c.bf16 %v1497_v15, %v1448_v5 }
 0x253   : > { %v1559_v41 = vpack.c.bf16 %v1402_v30, %v1353_v4 }
 0x254   : > { %1620 = vst [vmem:[%s3206_s19 + $0x178] sm:$0xff] %v1556_v39 }
 0x255   : > { %1623 = vst [vmem:[%s3206_s19 + $0x190] sm:$0xff] %v1559_v41 }
 0x257   : > { %v1450_v27 = vpop.f32.mrf.mxu2  ;;  %v1499_v55 = vpop.f32.mrf.mxu3 }
 0x258   : > { %v1451_v16 = vadd.f32 %v1450_v27, %v3340_v42  ;;  %v1500_v1 = vadd.f32 %v1499_v55, %v3343_v44  ;;  %v1354_v50 = vpop.f32.mrf.mxu0  ;;  %v1403_v24 = vpop.f32.mrf.mxu1 }
 0x259   : > { %v1355_v10 = vadd.f32 %v1354_v50, %v3328_v19  ;;  %v1404_v51 = vadd.f32 %v1403_v24, %v3331_v28 }
 0x25a   : > { %v1560_v52 = vpack.c.bf16 %v1500_v1, %v1451_v16 }
 0x25b   : > { %v1563_v54 = vpack.c.bf16 %v1404_v51, %v1355_v10 }
 0x25c   : > { %1624 = vst [vmem:[%s3206_s19 + $0x198] sm:$0xff] %v1560_v52 }
 0x25d   : > { %1627 = vst [vmem:[%s3206_s19 + $0x1b0] sm:$0xff] %v1563_v54 }
 0x25f   : > { %v1452_v32 = vpop.f32.mrf.mxu2  ;;  %v1501_v18 = vpop.f32.mrf.mxu3 }
 0x260   : > { %v1453_v57 = vadd.f32 %v1452_v32, %v3340_v42  ;;  %v1502_v37 = vadd.f32 %v1501_v18, %v3343_v44  ;;  %v1357_v58 = vpop.f32.mrf.mxu0  ;;  %v1406_v59 = vpop.f32.mrf.mxu1 }
 0x261   : > { %v1358_v25 = vadd.f32 %v1357_v58, %v3328_v19  ;;  %v1407_v43 = vadd.f32 %v1406_v59, %v3331_v28 }
 0x262   : > { %v1564_v33 = vpack.c.bf16 %v1502_v37, %v1453_v57 }
 0x263   : > { %v1567_v47 = vpack.c.bf16 %v1407_v43, %v1358_v25 }
 0x264   : > { %1628 = vst [vmem:[%s3206_s19 + $0x1b8] sm:$0xff] %v1564_v33 }
 0x265   : > { %1631 = vst [vmem:[%s3206_s19 + $0x1d0] sm:$0xff] %v1567_v47 }
 0x267   : > { %v1455_v61 = vpop.f32.mrf.mxu2  ;;  %v1504_v20 = vpop.f32.mrf.mxu3 }
 0x268   : > { %v1456_v62 = vadd.f32 %v1455_v61, %v3340_v42  ;;  %v1505_v53 = vadd.f32 %v1504_v20, %v3343_v44  ;;  %v1359_v35 = vpop.f32.mrf.mxu0  ;;  %v1408_v56 = vpop.f32.mrf.mxu1 }
 0x269   : > { %v1360_v2 = vadd.f32 %v1359_v35, %v3328_v19  ;;  %v1409_v40 = vadd.f32 %v1408_v56, %v3331_v28 }
 0x26a   : > { %v1568_v12 = vpack.c.bf16 %v1505_v53, %v1456_v62 }
 0x26b   : > { %v1571_v3 = vpack.c.bf16 %v1409_v40, %v1360_v2 }
 0x26c   : > { %1632 = vst [vmem:[%s3206_s19 + $0x1d8] sm:$0xff] %v1568_v12 }
 0x26d   : > { %1635 = vst [vmem:[%s3206_s19 + $0x1f0] sm:$0xff] %v1571_v3 }
 0x26f   : > { %v1457_v31 = vpop.f32.mrf.mxu2  ;;  %v1506_v9 = vpop.f32.mrf.mxu3 }
 0x270   : > { %v1458_v11 = vadd.f32 %v1457_v31, %v3340_v42  ;;  %v1507_v19 = vadd.f32 %v1506_v9, %v3343_v44 }
 0x272   : > { %v1572_v28 = vpack.c.bf16 %v1507_v19, %v1458_v11 }
 0x274   : > { %1636 = vst [vmem:[%s3206_s19 + $0x1f8] sm:$0xff] %v1572_v28 }
 0x275   : > { %2478 = shalt.err (!%p2475_p4)
}
 0x276   : > { %s2544_s29 = smov 512   ;;  %s2545_s19 = smov 32  }
 0x277   : > { %2188 = dma.vmem_to_hbm [thread:$0]  (%p2647_p3), %s1657_s13, 8192, %s1659_s14, %s1638_s25, %s2544_s29, %s2544_s29, %s2545_s19  }
 0x278 PF: > { %s1690_s0 = sand.u32 1, %s2521_s21   ;;  %p3537_p8 = scmp.ge.s32.totalorder %s2533_s24, 2 }
 0x279   : > { %s1691_s3 = scalar_lea.sflag [#allocation4], %s1690_s0 }
 0x27a   : > { %p2207_p2 = pnand %p3537_p8, %p2616_p6 }
 0x27c   : > { %p2208_p10 = pneg %p2207_p2 }
 0x27e   : > { %2512 = dma.done.wait (%p2208_p10), %s1691_s3, 8192  }
 0x27f   : > { %2514 = vsyncadd (%p2208_p10), %s1691_s3, 4294959104  ;;  %s1701_s23 = scalar_lea.sflag [#allocation12], %s1690_s0 }
 0x280   : > { %2516 = dma.done.wait (%p2208_p10), %s1701_s23, 2048  }
 0x281   : > { %2518 = vsyncadd (%p2208_p10), %s1701_s23, 4294965248  ;;  %s3538_s27 = sld [smem:[#allocation19_spill]]  ;;  %p27_p3 = scmp.ge.s32.totalorder %s2637_s18, 4  }
 0x282   : > { %s3539_s23 = sld [smem:[#allocation20_spill]]  ;;  %s3540_s21 = smov %s2525_s22 }
 0x283   : > { %s3542_s24 = smov %s2637_s18  ;;  %29 = sbr.rel (!%p27_p3) target bundleno = 14 (0xe), region = 123 }
 0x287   : > { %s3541_s22 = smov %s3538_s27 }
 0x288   :  { %1707 = vsyncpa [#allocation3], 1 }
 0x289   :  { %1709 = vsyncpa [#allocation3 + $0x1], 1 }
 0x28a   :  { %1710 = vsyncpa [#allocation6], 1 }
 0x28b   :  { %1712 = vsyncpa [#allocation6 + $0x1], 1 }
 0x28c   :  { %1713 = vsyncpa [#allocation9], 1 }
 0x28d   :  { %1714 = vsyncpa [#allocation4], 1 }
 0x28e   :  { %1716 = vsyncpa [#allocation4 + $0x1], 1 }
 0x28f   :  { %1717 = vsyncpa [#allocation12], 1 }
 0x290   :  { %1719 = vsyncpa [#allocation12 + $0x1], 1 }

</bundles_post_ra>
